<compile_context>
chip_gen: v7x
topology: tpu7x:2x2x1
jax: 0.10.0
libtpu: 0.0.40
codegen_flags: <defaults>
</compile_context>

<pallas_src>
import functools

import jax
import jax.numpy as jnp
from jax.experimental import pallas as pl
from jax.experimental.pallas import tpu as pltpu  # noqa: F401  (TPU backend)


# ----------------------------------------------------------------------------
# Fused kernel: im2col-conv (MXU) -> bias -> ReLU -> GAP (reshape+sum) -> FC
# Single invocation, whole problem resident in VMEM.
# ----------------------------------------------------------------------------
def _encoder_fused_kernel(patches_ref, cw_ref, cb_ref, fw_ref, fb_ref, o_ref,
                          *, n_regions, hw):
    # patches_ref: (M, Kp)  bf16   M = B*R*H*W, Kp = 32 (9*Cin zero-padded)
    # cw_ref:      (Kp, C)  bf16   C = resnet_out
    # cb_ref:      (1, C)   f32
    # fw_ref:      (C, G)   bf16   G = gcn_in
    # fb_ref:      (1, G)   f32
    # o_ref:       (N, G)   f32    N = B*R regions

    # 3x3 "same" conv as ONE bf16 im2col matmul on the MXU (f32 accumulation).
    conv = jnp.dot(patches_ref[...], cw_ref[...],
                   preferred_element_type=jnp.float32)            # (M, C) f32
    # Bias + ReLU in f32 on the VPU (v5e has no bf16 VALU).
    conv = jnp.maximum(conv + cb_ref[...], 0.0)

    # Global average pool in-kernel: split only the leading (sublane) dim —
    # layout-preserving — then reduce each region's H*W rows.  1/256 is exact.
    pooled = conv.reshape(n_regions, hw, conv.shape[-1]).sum(axis=1) * (1.0 / hw)

    # Fused FC epilogue (dropout = identity at inference): bf16 operands,
    # f32 accumulation, f32 bias add.
    o_ref[...] = jnp.dot(pooled.astype(jnp.bfloat16), fw_ref[...],
                         preferred_element_type=jnp.float32) + fb_ref[...]


def encoder_fused(patches, conv_w, conv_b, fc_w, fc_b, *, n_regions, hw, gcn_in):
    kernel = functools.partial(_encoder_fused_kernel, n_regions=n_regions, hw=hw)
    # No grid: one kernel invocation, whole arrays resident in VMEM (default).
    return pl.pallas_call(
        kernel,
        out_shape=jax.ShapeDtypeStruct((n_regions, gcn_in), jnp.float32),
    )(patches, conv_w, conv_b, fc_w, fc_b)


# ----------------------------------------------------------------------------
# Parameters + glue (patch extraction, K-padding, dtype casts) in plain JAX
# ----------------------------------------------------------------------------
K_PAD = 32  # contraction dim 9*Cin = 27 zero-padded to 32 (even bf16 sublanes)


def init_encoder_params(key, *, cin, resnet_out, gcn_in):
    k1, k2, k3, k4 = jax.random.split(key, 4)
    conv_w = jax.random.normal(k1, (3, 3, cin, resnet_out), jnp.float32) * 0.1
    conv_b = jax.random.normal(k2, (1, resnet_out), jnp.float32) * 0.1
    fc_w = jax.random.normal(k3, (resnet_out, gcn_in), jnp.float32) * 0.1
    fc_b = jax.random.normal(k4, (1, gcn_in), jnp.float32) * 0.1
    return dict(conv_w=conv_w, conv_b=conv_b, fc_w=fc_w, fc_b=fc_b)


def encoder_forward(params, x):
    """x: (B, R, Cin, H, W) in PyTorch NCHW-per-region convention."""
    B, R, Cin, H, W = x.shape
    N = B * R
    HW = H * W
    K = 9 * Cin
    C = params["conv_w"].shape[-1]
    G = params["fc_w"].shape[-1]

    # NCHW -> NHWC, flatten regions, cast to bf16 up front (cheapest place).
    xr = jnp.transpose(x.reshape(N, Cin, H, W), (0, 2, 3, 1)).astype(jnp.bfloat16)

    # im2col as ONE conv op with a constant identity filter: output channel
    # o = (kh*3 + kw)*Cin + c holds x[h+kh-1, w+kw-1, c]; columns 27..31 are
    # zero, so the K-padding to 32 comes for free.
    eye = jnp.eye(K, K_PAD, dtype=jnp.bfloat16).reshape(3, 3, Cin, K_PAD)
    patches = jax.lax.conv_general_dilated(
        xr, eye, window_strides=(1, 1), padding="SAME",
        dimension_numbers=("NHWC", "HWIO", "NHWC"))               # (N, H, W, 32)
    patches = patches.reshape(N * HW, K_PAD)                      # (M, 32) bf16

    # Conv weight rows ordered (kh, kw, cin) to match the patch channels;
    # zero-pad rows 27..31; bf16 operands for the MXU.
    cw = jnp.pad(params["conv_w"].reshape(K, C),
                 ((0, K_PAD - K), (0, 0))).astype(jnp.bfloat16)   # (32, C)
    fw = params["fc_w"].astype(jnp.bfloat16)                      # (C, G)

    out = encoder_fused(patches, cw, params["conv_b"], fw, params["fc_b"],
                        n_regions=N, hw=HW, gcn_in=G)             # (N, G) f32
    return out.reshape(B, R, G)


# Pure-JAX f32 reference of the same synthetic RegionalCNN (sanity check only).
def encoder_reference(params, x):
    B, R, Cin, H, W = x.shape
    N = B * R
    xr = jnp.transpose(x.reshape(N, Cin, H, W), (0, 2, 3, 1))
    conv = jax.lax.conv_general_dilated(
        xr, params["conv_w"], (1, 1), "SAME",
        dimension_numbers=("NHWC", "HWIO", "NHWC"))
    conv = jnp.maximum(conv + params["conv_b"].reshape(1, 1, 1, -1), 0.0)
    pooled = conv.mean(axis=(1, 2))                               # (N, C)
    out = pooled @ params["fc_w"] + params["fc_b"]
    return out.reshape(B, R, -1)


if __name__ == "__main__":
    config = dict(resnet_out=32, gcn_in=32, cnn_freeze=True, cnn_dropout=0.1)
    B, R, Cin, H, W = 2, 4, 3, 16, 16

    key = jax.random.PRNGKey(0)
    kx, kp = jax.random.split(key)
    x = jax.random.normal(kx, (B, R, Cin, H, W), jnp.float32)
    params = init_encoder_params(
        kp, cin=Cin, resnet_out=config["resnet_out"], gcn_in=config["gcn_in"])

    out = jax.block_until_ready(encoder_forward(params, x))
    assert out.shape == (B, R, config["gcn_in"])

    # bf16 MXU operands vs. f32 reference: tolerate ~1e-2-scale error.
    ref = jax.block_until_ready(encoder_reference(params, x))
    max_err = float(jnp.max(jnp.abs(out - ref)))
    assert max_err < 5e-2, f"max abs err vs reference: {max_err}"

    print("KERNEL_OK")
</pallas_src>

<mosaic_0001>
module attributes {stable_mosaic.version = 11 : i64} {
  func.func @_encoder_fused_kernel(%arg0: memref<2048x32xbf16, #tpu.memory_space<vmem>>, %arg1: memref<32x32xbf16, #tpu.memory_space<vmem>>, %arg2: memref<1x32xf32, #tpu.memory_space<vmem>>, %arg3: memref<32x32xbf16, #tpu.memory_space<vmem>>, %arg4: memref<1x32xf32, #tpu.memory_space<vmem>>, %arg5: memref<8x32xf32, #tpu.memory_space<vmem>>) attributes {dimension_semantics = [], scalar_prefetch = 0 : i64, scratch_operands = 0 : i64, tpu.core_type = #tpu.core_type<tc>} {
    %c0 = arith.constant 0 : index
    %c0_0 = arith.constant 0 : index
    %0 = vector.load %arg0[%c0, %c0_0] : memref<2048x32xbf16, #tpu.memory_space<vmem>>, vector<2048x32xbf16>
    %c0_1 = arith.constant 0 : index
    %c0_2 = arith.constant 0 : index
    %1 = vector.load %arg1[%c0_1, %c0_2] : memref<32x32xbf16, #tpu.memory_space<vmem>>, vector<32x32xbf16>
    %cst = arith.constant dense<0.000000e+00> : vector<2048x32xf32>
    %2 = tpu.matmul %0, %1, %cst {dimension_numbers = #tpu.dot_dimension_numbers<[1], [0], [0], [1], [0, 0, 1, 1], [], []>} : vector<2048x32xbf16>, vector<32x32xbf16>, vector<2048x32xf32> -> vector<2048x32xf32>
    %c0_3 = arith.constant 0 : index
    %c0_4 = arith.constant 0 : index
    %3 = vector.load %arg2[%c0_3, %c0_4] : memref<1x32xf32, #tpu.memory_space<vmem>>, vector<1x32xf32>
    %4 = vector.broadcast %3 : vector<1x32xf32> to vector<2048x32xf32>
    %5 = arith.addf %2, %4 : vector<2048x32xf32>
    %cst_5 = arith.constant 0.000000e+00 : f32
    %6 = vector.broadcast %cst_5 : f32 to vector<2048x32xf32>
    %7 = arith.maximumf %5, %6 : vector<2048x32xf32>
    %8 = vector.shape_cast %7 : vector<2048x32xf32> to vector<8x256x32xf32>
    %cst_6 = arith.constant dense<0.000000e+00> : vector<8x32xf32>
    %9 = vector.multi_reduction <add>, %8, %cst_6 [1] : vector<8x256x32xf32> to vector<8x32xf32>
    %cst_7 = arith.constant 3.906250e-03 : f32
    %10 = vector.broadcast %cst_7 : f32 to vector<8x32xf32>
    %11 = arith.mulf %9, %10 : vector<8x32xf32>
    %12 = arith.truncf %11 : vector<8x32xf32> to vector<8x32xbf16>
    %c0_8 = arith.constant 0 : index
    %c0_9 = arith.constant 0 : index
    %13 = vector.load %arg3[%c0_8, %c0_9] : memref<32x32xbf16, #tpu.memory_space<vmem>>, vector<32x32xbf16>
    %cst_10 = arith.constant dense<0.000000e+00> : vector<8x32xf32>
    %14 = tpu.matmul %12, %13, %cst_10 {dimension_numbers = #tpu.dot_dimension_numbers<[1], [0], [0], [1], [0, 0, 1, 1], [], []>} : vector<8x32xbf16>, vector<32x32xbf16>, vector<8x32xf32> -> vector<8x32xf32>
    %c0_11 = arith.constant 0 : index
    %c0_12 = arith.constant 0 : index
    %15 = vector.load %arg4[%c0_11, %c0_12] : memref<1x32xf32, #tpu.memory_space<vmem>>, vector<1x32xf32>
    %16 = vector.broadcast %15 : vector<1x32xf32> to vector<8x32xf32>
    %17 = arith.addf %14, %16 : vector<8x32xf32>
    %c0_13 = arith.constant 0 : index
    %c0_14 = arith.constant 0 : index
    %18 = vector.load %arg5[%c0_13, %c0_14] : memref<8x32xf32, #tpu.memory_space<vmem>>, vector<8x32xf32>
    tpu.vector_store %arg5[%c0_13, %c0_14], %17 {strides = array<i32>} : memref<8x32xf32, #tpu.memory_space<vmem>>, vector<8x32xf32>,
    return
  }
}

</mosaic_0001>

<bundles_post_ra>
// kernel: tpu_custom_call.1
= control target key start
LH: loop header
LB: loop body
LE: loop exit
PB: predicated region body
PF: predicated region fallthrough
CT: control target
= control target key end

     0   :  { %vm941_vm0 = vcmask 261120   ;;  %s5511_s0 = inlined_call_operand.vmem [shape: bf16[2048,32], index: 0, kind: input, shape index: {}]   ;;  %s5512_s1 = inlined_call_operand.vmem [shape: bf16[32,32], index: 1, kind: input, shape index: {}]   ;;  %s5513_s2 = inlined_call_operand.vmem [shape: f32[1,32], index: 2, kind: input, shape index: {}]   ;;  %s5514_s3 = inlined_call_operand.vmem [shape: bf16[32,32], index: 3, kind: input, shape index: {}]   ;;  %s5515_s4 = inlined_call_operand.vmem [shape: f32[1,32], index: 4, kind: input, shape index: {}]   ;;  %s5516_s5 = inlined_call_operand.hbm [shape: f32[8,32], index: 5, kind: output, shape index: {}]  }
   0x1   :  { %v3990_v0 = vld [vmem:[%s5512_s1] sm:$0xff]   ;;  %v3991_v1 = vld [vmem:[%s5512_s1 + $0x8] sm:$0xff]   ;;  %v3994_v4 = vld [vmem:[%s5511_s0 + $0x10] sm:$0xff]  }
   0x2   :  { %3715 = vmatprep.subr.bf16.mxu0 %v3990_v0  ;;  %v3992_v2 = vld [vmem:[%s5511_s0] sm:$0xff]   ;;  %3983 = vmatprep.subr.bf16.mxu1 %v3990_v0  ;;  %v3993_v3 = vld [vmem:[%s5511_s0 + $0x8] sm:$0xff]   ;;  %v3995_v5 = vld [vmem:[%s5511_s0 + $0x18] sm:$0xff]  }
   0x3   :  { %3716 = vmatpush3.bf16.msra.mxu0 %v3990_v0  ;;  %3985 = vmatpush3.bf16.msra.mxu1 %v3990_v0  ;;  %v3996_v6 = vld [vmem:[%s5511_s0 + $0x20] sm:$0xff]   ;;  %v4008_v7 = vld [vmem:[%s5511_s0 + $0x210] sm:$0xff]   ;;  %v4009_v8 = vld [vmem:[%s5511_s0 + $0x218] sm:$0xff]  }
   0x4   :  { %3717 = vmatprep.subr.bf16.mxu0 %v3991_v1  ;;  %3719 = vmatprep.mubr.msk.bf16.mxu0 %vm941_vm0, %v3992_v2  ;;  %v3997_v9 = vld [vmem:[%s5511_s0 + $0x28] sm:$0xff]   ;;  %v4012_v10 = vld [vmem:[%s5511_s0 + $0x220] sm:$0xff]   ;;  %v3998_v11 = vld [vmem:[%s5511_s0 + $0x30] sm:$0xff]  }
   0x5   :  { %3984 = vmatprep.subr.bf16.mxu1 %v3991_v1  ;;  %3851 = vmatprep.mubr.msk.bf16.mxu1 %vm941_vm0, %v4008_v7  ;;  %v4013_v12 = vld [vmem:[%s5511_s0 + $0x228] sm:$0xff]   ;;  %v4016_v13 = vld [vmem:[%s5511_s0 + $0x230] sm:$0xff]   ;;  %v3999_v14 = vld [vmem:[%s5511_s0 + $0x38] sm:$0xff]  }
   0x6   :  { %v4000_v15 = vld [vmem:[%s5511_s0 + $0x40] sm:$0xff]   ;;  %v4017_v16 = vld [vmem:[%s5511_s0 + $0x238] sm:$0xff]   ;;  %v4001_v18 = vld [vmem:[%s5511_s0 + $0x48] sm:$0xff]  }
   0x7   :  { %3718 = vmatpush3.bf16.msra.mxu0 %v3991_v1  ;;  %3986 = vmatpush3.bf16.msra.mxu1 %v3991_v1  ;;  %v4020_v17 = vld [vmem:[%s5511_s0 + $0x240] sm:$0xff]   ;;  %v4002_v19 = vld [vmem:[%s5511_s0 + $0x50] sm:$0xff]   ;;  %v4021_v20 = vld [vmem:[%s5511_s0 + $0x248] sm:$0xff]  }
   0x8   :  { %v4024_v21 = vld [vmem:[%s5511_s0 + $0x250] sm:$0xff]   ;;  %v4003_v22 = vld [vmem:[%s5511_s0 + $0x58] sm:$0xff]   ;;  %v4004_v23 = vld [vmem:[%s5511_s0 + $0x60] sm:$0xff]  }
   0x9   :  { %v4025_v24 = vld [vmem:[%s5511_s0 + $0x258] sm:$0xff]   ;;  %v4028_v25 = vld [vmem:[%s5511_s0 + $0x260] sm:$0xff]   ;;  %v4005_v26 = vld [vmem:[%s5511_s0 + $0x68] sm:$0xff]  }
   0xa   :  { %3720 = vmatmul.mubr.msk.bf16.vlgmr.msra.gmra.mrb[0].mxu0 %vm941_vm0, %v3993_v3  ;;  %3852 = vmatmul.mubr.msk.bf16.vlgmr.msra.gmra.mrb[0].mxu1 %vm941_vm0, %v4009_v8  ;;  %v4006_v27 = vld [vmem:[%s5511_s0 + $0x70] sm:$0xff]   ;;  %v4029_v28 = vld [vmem:[%s5511_s0 + $0x268] sm:$0xff]   ;;  %v4007_v30 = vld [vmem:[%s5511_s0 + $0x78] sm:$0xff]  }
   0xb   :  { %3723 = vmatprep.mubr.msk.bf16.mxu0 %vm941_vm0, %v3994_v4  ;;  %3855 = vmatprep.mubr.msk.bf16.mxu1 %vm941_vm0, %v4012_v10  ;;  %v4032_v29 = vld [vmem:[%s5511_s0 + $0x270] sm:$0xff]   ;;  %v4010_v31 = vld [vmem:[%s5511_s0 + $0x80] sm:$0xff]   ;;  %v4033_v32 = vld [vmem:[%s5511_s0 + $0x278] sm:$0xff]  }
   0xc   :  { %v4036_v33 = vld [vmem:[%s5511_s0 + $0x280] sm:$0xff]   ;;  %v4011_v34 = vld [vmem:[%s5511_s0 + $0x88] sm:$0xff]   ;;  %v4014_v35 = vld [vmem:[%s5511_s0 + $0x90] sm:$0xff]  }
   0xd   :  { %v4037_v36 = vld [vmem:[%s5511_s0 + $0x288] sm:$0xff]   ;;  %v4040_v37 = vld [vmem:[%s5511_s0 + $0x290] sm:$0xff]   ;;  %v4015_v38 = vld [vmem:[%s5511_s0 + $0x98] sm:$0xff]  }
   0xe   :  { %v4018_v39 = vld [vmem:[%s5511_s0 + $0xa0] sm:$0xff]   ;;  %v4041_v40 = vld [vmem:[%s5511_s0 + $0x298] sm:$0xff]   ;;  %v4019_v42 = vld [vmem:[%s5511_s0 + $0xa8] sm:$0xff]  }
   0xf   :  { %v4044_v41 = vld [vmem:[%s5511_s0 + $0x2a0] sm:$0xff]   ;;  %v4022_v43 = vld [vmem:[%s5511_s0 + $0xb0] sm:$0xff]   ;;  %v4045_v44 = vld [vmem:[%s5511_s0 + $0x2a8] sm:$0xff]  }
  0x10   :  { %v4048_v45 = vld [vmem:[%s5511_s0 + $0x2b0] sm:$0xff]   ;;  %v4023_v46 = vld [vmem:[%s5511_s0 + $0xb8] sm:$0xff]   ;;  %v4026_v47 = vld [vmem:[%s5511_s0 + $0xc0] sm:$0xff]  }
  0x11   :  { %v4049_v48 = vld [vmem:[%s5511_s0 + $0x2b8] sm:$0xff]   ;;  %v4052_v49 = vld [vmem:[%s5511_s0 + $0x2c0] sm:$0xff]   ;;  %v4027_v50 = vld [vmem:[%s5511_s0 + $0xc8] sm:$0xff]  }
  0x12   :  { %3724 = vmatmul.mubr.msk.bf16.gmra.mrb[4].mxu0 %vm941_vm0, %v3995_v5  ;;  %3856 = vmatmul.mubr.msk.bf16.gmra.mrb[4].mxu1 %vm941_vm0, %v4013_v12  ;;  %v4030_v51 = vld [vmem:[%s5511_s0 + $0xd0] sm:$0xff]   ;;  %v4053_v52 = vld [vmem:[%s5511_s0 + $0x2c8] sm:$0xff]   ;;  %v4031_v54 = vld [vmem:[%s5511_s0 + $0xd8] sm:$0xff]  }
  0x13   :  { %3727 = vmatprep.mubr.msk.bf16.mxu0 %vm941_vm0, %v3996_v6  ;;  %3859 = vmatprep.mubr.msk.bf16.mxu1 %vm941_vm0, %v4016_v13  ;;  %v4056_v53 = vld [vmem:[%s5511_s0 + $0x2d0] sm:$0xff]   ;;  %v4034_v55 = vld [vmem:[%s5511_s0 + $0xe0] sm:$0xff]   ;;  %v4057_v56 = vld [vmem:[%s5511_s0 + $0x2d8] sm:$0xff]  }
  0x14   :  { %v4060_v57 = vld [vmem:[%s5511_s0 + $0x2e0] sm:$0xff]   ;;  %v4035_v58 = vld [vmem:[%s5511_s0 + $0xe8] sm:$0xff]   ;;  %v4038_v59 = vld [vmem:[%s5511_s0 + $0xf0] sm:$0xff]  }
  0x15   :  { %v4061_v60 = vld [vmem:[%s5511_s0 + $0x2e8] sm:$0xff]   ;;  %v4064_v61 = vld [vmem:[%s5511_s0 + $0x2f0] sm:$0xff]  }
  0x1a   :  { %3728 = vmatmul.mubr.msk.bf16.gmra.mrb[8].mxu0 %vm941_vm0, %v3997_v9  ;;  %3860 = vmatmul.mubr.msk.bf16.gmra.mrb[8].mxu1 %vm941_vm0, %v4017_v16 }
  0x1b   :  { %3731 = vmatprep.mubr.msk.bf16.mxu0 %vm941_vm0, %v3998_v11  ;;  %3863 = vmatprep.mubr.msk.bf16.mxu1 %vm941_vm0, %v4020_v17 }
  0x22   :  { %3732 = vmatmul.mubr.msk.bf16.gmra.mrb[12].mxu0 %vm941_vm0, %v3999_v14  ;;  %3864 = vmatmul.mubr.msk.bf16.gmra.mrb[12].mxu1 %vm941_vm0, %v4021_v20 }
  0x23   :  { %3735 = vmatprep.mubr.msk.bf16.mxu0 %vm941_vm0, %v4000_v15  ;;  %3867 = vmatprep.mubr.msk.bf16.mxu1 %vm941_vm0, %v4024_v21 }
  0x2a   :  { %3736 = vmatmul.mubr.msk.bf16.gmra.mrb[16].mxu0 %vm941_vm0, %v4001_v18  ;;  %3868 = vmatmul.mubr.msk.bf16.gmra.mrb[16].mxu1 %vm941_vm0, %v4025_v24 }
  0x2b   :  { %3739 = vmatprep.mubr.msk.bf16.mxu0 %vm941_vm0, %v4002_v19  ;;  %3871 = vmatprep.mubr.msk.bf16.mxu1 %vm941_vm0, %v4028_v25 }
  0x32   :  { %3740 = vmatmul.mubr.msk.bf16.gmra.mrb[20].mxu0 %vm941_vm0, %v4003_v22  ;;  %3872 = vmatmul.mubr.msk.bf16.gmra.mrb[20].mxu1 %vm941_vm0, %v4029_v28 }
  0x33   :  { %3743 = vmatprep.mubr.msk.bf16.mxu0 %vm941_vm0, %v4004_v23  ;;  %3875 = vmatprep.mubr.msk.bf16.mxu1 %vm941_vm0, %v4032_v29 }
  0x3a   :  { %3744 = vmatmul.mubr.msk.bf16.gmra.mrb[24].mxu0 %vm941_vm0, %v4005_v26  ;;  %3876 = vmatmul.mubr.msk.bf16.gmra.mrb[24].mxu1 %vm941_vm0, %v4033_v32 }
  0x3b   :  { %3747 = vmatprep.mubr.msk.bf16.mxu0 %vm941_vm0, %v4006_v27  ;;  %3879 = vmatprep.mubr.msk.bf16.mxu1 %vm941_vm0, %v4036_v33 }
  0x42   :  { %3748 = vmatmul.mubr.msk.bf16.gmra.mrb[28].mxu0 %vm941_vm0, %v4007_v30  ;;  %3880 = vmatmul.mubr.msk.bf16.gmra.mrb[28].mxu1 %vm941_vm0, %v4037_v36 }
  0x43   :  { %3751 = vmatprep.mubr.msk.bf16.mxu0 %vm941_vm0, %v4010_v31  ;;  %3883 = vmatprep.mubr.msk.bf16.mxu1 %vm941_vm0, %v4040_v37 }
  0x4a   :  { %3752 = vmatmul.mubr.msk.bf16.gmra.mrb[32].mxu0 %vm941_vm0, %v4011_v34  ;;  %3884 = vmatmul.mubr.msk.bf16.gmra.mrb[32].mxu1 %vm941_vm0, %v4041_v40 }
  0x4b   :  { %3755 = vmatprep.mubr.msk.bf16.mxu0 %vm941_vm0, %v4014_v35  ;;  %3887 = vmatprep.mubr.msk.bf16.mxu1 %vm941_vm0, %v4044_v41 }
  0x52   :  { %3756 = vmatmul.mubr.msk.bf16.gmra.mrb[36].mxu0 %vm941_vm0, %v4015_v38  ;;  %3888 = vmatmul.mubr.msk.bf16.gmra.mrb[36].mxu1 %vm941_vm0, %v4045_v44 }
  0x53   :  { %3759 = vmatprep.mubr.msk.bf16.mxu0 %vm941_vm0, %v4018_v39  ;;  %3891 = vmatprep.mubr.msk.bf16.mxu1 %vm941_vm0, %v4048_v45 }
  0x5a   :  { %3760 = vmatmul.mubr.msk.bf16.gmra.mrb[40].mxu0 %vm941_vm0, %v4019_v42  ;;  %3892 = vmatmul.mubr.msk.bf16.gmra.mrb[40].mxu1 %vm941_vm0, %v4049_v48 }
  0x5b   :  { %3763 = vmatprep.mubr.msk.bf16.mxu0 %vm941_vm0, %v4022_v43  ;;  %3895 = vmatprep.mubr.msk.bf16.mxu1 %vm941_vm0, %v4052_v49 }
  0x62   :  { %3764 = vmatmul.mubr.msk.bf16.gmra.mrb[44].mxu0 %vm941_vm0, %v4023_v46  ;;  %3896 = vmatmul.mubr.msk.bf16.gmra.mrb[44].mxu1 %vm941_vm0, %v4053_v52 }
  0x63   :  { %3767 = vmatprep.mubr.msk.bf16.mxu0 %vm941_vm0, %v4026_v47  ;;  %3899 = vmatprep.mubr.msk.bf16.mxu1 %vm941_vm0, %v4056_v53 }
  0x6a   :  { %3768 = vmatmul.mubr.msk.bf16.gmra.mrb[48].mxu0 %vm941_vm0, %v4027_v50  ;;  %3900 = vmatmul.mubr.msk.bf16.gmra.mrb[48].mxu1 %vm941_vm0, %v4057_v56 }
  0x6b   :  { %3771 = vmatprep.mubr.msk.bf16.mxu0 %vm941_vm0, %v4030_v51  ;;  %3903 = vmatprep.mubr.msk.bf16.mxu1 %vm941_vm0, %v4060_v57 }
  0x72   :  { %3772 = vmatmul.mubr.msk.bf16.gmra.mrb[52].mxu0 %vm941_vm0, %v4031_v54  ;;  %3904 = vmatmul.mubr.msk.bf16.gmra.mrb[52].mxu1 %vm941_vm0, %v4061_v60 }
  0x73   :  { %3775 = vmatprep.mubr.msk.bf16.mxu0 %vm941_vm0, %v4034_v55 }
  0x7a   :  { %3776 = vmatmul.mubr.msk.bf16.gmra.mrb[56].mxu0 %vm941_vm0, %v4035_v58 }
  0x7b   :  { %3779 = vmatprep.mubr.msk.bf16.mxu0 %vm941_vm0, %v4038_v59 }
  0x7c   :  { %10 = vsyncpa [#allocation3], 0  ;;  %v4039_v62 = vld [vmem:[%s5511_s0 + $0xf8] sm:$0xff]   ;;  %3907 = vmatprep.mubr.msk.bf16.mxu1 %vm941_vm0, %v4064_v61  ;;  %v4042_v63 = vld [vmem:[%s5511_s0 + $0x100] sm:$0xff]   ;;  %v5517_v38 = vmov 0.0   ;;  %vm3234_vm1 = vcmask 1041409  }
  0x7d   :  { %v4065_v0 = vld [vmem:[%s5511_s0 + $0x2f8] sm:$0xff]   ;;  %v4068_v1 = vld [vmem:[%s5511_s0 + $0x300] sm:$0xff]   ;;  %v4043_v2 = vld [vmem:[%s5511_s0 + $0x108] sm:$0xff]   ;;  %3975 = vmatprep.subr.bf16.mxu1 %v5517_v38  ;;  %vm3236_vm2 = vcmask 1042434   ;;  %vm4149_vm3 = vmmov 0   ;;  %vm3238_vm4 = vcmask 1043459  }
  0x7e   :  { %3908 = vmatmul.mubr.msk.bf16.gmra.mrb[56].mxu1 %vm941_vm0, %v4065_v0  ;;  %v4046_v3 = vld [vmem:[%s5511_s0 + $0x110] sm:$0xff]   ;;  %v4069_v4 = vld [vmem:[%s5511_s0 + $0x308] sm:$0xff]   ;;  %v4047_v6 = vld [vmem:[%s5511_s0 + $0x118] sm:$0xff]   ;;  %vm3240_vm5 = vcmask 1044484   ;;  %vm3242_vm6 = vcmask 1045509   ;;  %vm3244_vm7 = vcmask 1046534  }
  0x7f   :  { %3911 = vmatprep.mubr.msk.bf16.mxu1 %vm941_vm0, %v4068_v1  ;;  %v4072_v5 = vld [vmem:[%s5511_s0 + $0x310] sm:$0xff]   ;;  %v4050_v7 = vld [vmem:[%s5511_s0 + $0x120] sm:$0xff]   ;;  %v4073_v8 = vld [vmem:[%s5511_s0 + $0x318] sm:$0xff]   ;;  %vm3246_vm8 = vcmask 1047559   ;;  %s4150_s1 = smov [#allocation2]  }
  0x80   :  { %v4076_v9 = vld [vmem:[%s5511_s0 + $0x320] sm:$0xff]   ;;  %v4051_v10 = vld [vmem:[%s5511_s0 + $0x128] sm:$0xff]   ;;  %v4054_v11 = vld [vmem:[%s5511_s0 + $0x130] sm:$0xff]   ;;  %s3311_s27 = sshll.u32 %s4150_s1, 4  ;;  %s3312_s27 = int_to_ptr.vmem [resolvable:$true] %s3311_s27 }
  0x81   :  { %v4077_v12 = vld [vmem:[%s5511_s0 + $0x328] sm:$0xff]   ;;  %v4080_v13 = vld [vmem:[%s5511_s0 + $0x330] sm:$0xff]   ;;  %v4055_v14 = vld [vmem:[%s5511_s0 + $0x138] sm:$0xff]   ;;  %s4124_s28 = scalar_lea.vmem %s3312_s27, 128  ;;  %p4129_p1 = scmp.lt.s32.totalorder %s3312_s27, %s3312_s27 }
  0x82   :  { %3780 = vmatmul.mubr.msk.bf16.gmra.mrb[60].mxu0 %vm941_vm0, %v4039_v62  ;;  %v4058_v15 = vld [vmem:[%s5511_s0 + $0x140] sm:$0xff]   ;;  %v4081_v16 = vld [vmem:[%s5511_s0 + $0x338] sm:$0xff]   ;;  %v4059_v18 = vld [vmem:[%s5511_s0 + $0x148] sm:$0xff]   ;;  %p4125_p0 = scmp.ne.s32.totalorder %s3312_s27, %s4124_s28  ;;  %p4130_p2 = scmp.lt.s32.totalorder %s4124_s28, %s4124_s28 }
  0x83   :  { %3783 = vmatprep.mubr.msk.bf16.mxu0 %vm941_vm0, %v4042_v63  ;;  %v4084_v17 = vld [vmem:[%s5511_s0 + $0x340] sm:$0xff]   ;;  %v4062_v19 = vld [vmem:[%s5511_s0 + $0x150] sm:$0xff]   ;;  %v4085_v20 = vld [vmem:[%s5511_s0 + $0x348] sm:$0xff]  }
  0x84   :  { %v4088_v21 = vld [vmem:[%s5511_s0 + $0x350] sm:$0xff]   ;;  %v4063_v22 = vld [vmem:[%s5511_s0 + $0x158] sm:$0xff]   ;;  %v4066_v23 = vld [vmem:[%s5511_s0 + $0x160] sm:$0xff]   ;;  %p4131_p3 = por %p4130_p2, %p4129_p1 }
  0x85   :  { %v4089_v24 = vld [vmem:[%s5511_s0 + $0x358] sm:$0xff]   ;;  %v4092_v25 = vld [vmem:[%s5511_s0 + $0x360] sm:$0xff]   ;;  %v4067_v26 = vld [vmem:[%s5511_s0 + $0x168] sm:$0xff]  }
  0x86   :  { %3912 = vmatmul.mubr.msk.bf16.gmra.mrb[60].mxu1 %vm941_vm0, %v4069_v4  ;;  %v4070_v27 = vld [vmem:[%s5511_s0 + $0x170] sm:$0xff]   ;;  %v4093_v28 = vld [vmem:[%s5511_s0 + $0x368] sm:$0xff]   ;;  %v4071_v30 = vld [vmem:[%s5511_s0 + $0x178] sm:$0xff]   ;;  %p4132_p4 = pnand %p4131_p3, %p4125_p0 }
  0x87   :  { %3915 = vmatprep.mubr.msk.bf16.mxu1 %vm941_vm0, %v4072_v5  ;;  %v4096_v29 = vld [vmem:[%s5511_s0 + $0x370] sm:$0xff]   ;;  %v4074_v31 = vld [vmem:[%s5511_s0 + $0x180] sm:$0xff]   ;;  %v4097_v32 = vld [vmem:[%s5511_s0 + $0x378] sm:$0xff]  }
  0x88   :  { %v4100_v33 = vld [vmem:[%s5511_s0 + $0x380] sm:$0xff]   ;;  %v4075_v34 = vld [vmem:[%s5511_s0 + $0x188] sm:$0xff]   ;;  %v4078_v35 = vld [vmem:[%s5511_s0 + $0x190] sm:$0xff]  }
  0x89   :  { %v4120_v36 = vld [vmem:[%s5514_s3] sm:$0xff]   ;;  %v4101_v37 = vld [vmem:[%s5511_s0 + $0x388] sm:$0xff]   ;;  %v4104_v39 = vld [vmem:[%s5511_s0 + $0x390] sm:$0xff]  }
  0x8a   :  { %3784 = vmatmul.mubr.msk.bf16.gmra.mrb[64].mxu0 %vm941_vm0, %v4043_v2  ;;  %3976 = vmatpush3.bf16.msra.mxu1 %v4120_v36  ;;  %v4079_v40 = vld [vmem:[%s5511_s0 + $0x198] sm:$0xff]   ;;  %v4082_v41 = vld [vmem:[%s5511_s0 + $0x1a0] sm:$0xff]   ;;  %v4083_v44 = vld [vmem:[%s5511_s0 + $0x1a8] sm:$0xff]  }
  0x8b   :  { %3787 = vmatprep.mubr.msk.bf16.mxu0 %vm941_vm0, %v4046_v3  ;;  %3977 = vmatprep.subr.bf16.mxu1 %v5517_v38  ;;  %v4105_v42 = vld [vmem:[%s5511_s0 + $0x398] sm:$0xff]   ;;  %v4108_v43 = vld [vmem:[%s5511_s0 + $0x3a0] sm:$0xff]   ;;  %v4086_v45 = vld [vmem:[%s5511_s0 + $0x1b0] sm:$0xff]  }
  0x8c   :  { %v4109_v46 = vld [vmem:[%s5511_s0 + $0x3a8] sm:$0xff]   ;;  %v4110_v47 = vld [vmem:[%s5511_s0 + $0x3b0] sm:$0xff]   ;;  %v4625_v48 = vld [vmem:[%s5513_s2] ss:$0 sm:$0xff] }
  0x8d   :  { %v4087_v51 = vld [vmem:[%s5511_s0 + $0x1b8] sm:$0xff]   ;;  %v4090_v55 = vld [vmem:[%s5511_s0 + $0x1c0] sm:$0xff]  }
  0x8e   :  { %3916 = vmatmul.mubr.msk.bf16.gmra.mrb[64].mxu1 %vm941_vm0, %v4073_v8  ;;  %v4111_v60 = vld [vmem:[%s5511_s0 + $0x3b8] sm:$0xff]   ;;  %v4112_v61 = vld [vmem:[%s5511_s0 + $0x3c0] sm:$0xff]  }
  0x8f   :  { %3919 = vmatprep.mubr.msk.bf16.mxu1 %vm941_vm0, %v4076_v9 }
  0x92   :  { %3788 = vmatmul.mubr.msk.bf16.gmra.mrb[68].mxu0 %vm941_vm0, %v4047_v6  ;;  %v4091_v6 = vld [vmem:[%s5511_s0 + $0x1c8] sm:$0xff]  }
  0x93   :  { %3791 = vmatprep.mubr.msk.bf16.mxu0 %vm941_vm0, %v4050_v7 }
  0x96   :  { %3920 = vmatmul.mubr.msk.bf16.gmra.mrb[68].mxu1 %vm941_vm0, %v4077_v12 }
  0x97   :  { %3923 = vmatprep.mubr.msk.bf16.mxu1 %vm941_vm0, %v4080_v13 }
  0x9a   :  { %3792 = vmatmul.mubr.msk.bf16.gmra.mrb[72].mxu0 %vm941_vm0, %v4051_v10 }
  0x9b   :  { %3795 = vmatprep.mubr.msk.bf16.mxu0 %vm941_vm0, %v4054_v11  ;;  %v4094_v11 = vld [vmem:[%s5511_s0 + $0x1d0] sm:$0xff]  }
  0x9e   :  { %3924 = vmatmul.mubr.msk.bf16.gmra.mrb[72].mxu1 %vm941_vm0, %v4081_v16 }
  0x9f   :  { %3927 = vmatprep.mubr.msk.bf16.mxu1 %vm941_vm0, %v4084_v17 }
  0xa2   :  { %3796 = vmatmul.mubr.msk.bf16.gmra.mrb[76].mxu0 %vm941_vm0, %v4055_v14 }
  0xa3   :  { %3799 = vmatprep.mubr.msk.bf16.mxu0 %vm941_vm0, %v4058_v15 }
  0xa6   :  { %3928 = vmatmul.mubr.msk.bf16.gmra.mrb[76].mxu1 %vm941_vm0, %v4085_v20 }
  0xa7   :  { %3931 = vmatprep.mubr.msk.bf16.mxu1 %vm941_vm0, %v4088_v21 }
  0xaa   :  { %3800 = vmatmul.mubr.msk.bf16.gmra.mrb[80].mxu0 %vm941_vm0, %v4059_v18 }
  0xab   :  { %3803 = vmatprep.mubr.msk.bf16.mxu0 %vm941_vm0, %v4062_v19  ;;  %v4113_v19 = vld [vmem:[%s5511_s0 + $0x3c8] sm:$0xff]  }
  0xae   :  { %3932 = vmatmul.mubr.msk.bf16.gmra.mrb[80].mxu1 %vm941_vm0, %v4089_v24 }
  0xaf   :  { %3935 = vmatprep.mubr.msk.bf16.mxu1 %vm941_vm0, %v4092_v25 }
  0xb2   :  { %3804 = vmatmul.mubr.msk.bf16.gmra.mrb[84].mxu0 %vm941_vm0, %v4063_v22 }
  0xb3   :  { %3807 = vmatprep.mubr.msk.bf16.mxu0 %vm941_vm0, %v4066_v23  ;;  %v4114_v23 = vld [vmem:[%s5511_s0 + $0x3d0] sm:$0xff]  }
  0xb6   :  { %3936 = vmatmul.mubr.msk.bf16.gmra.mrb[84].mxu1 %vm941_vm0, %v4093_v28 }
  0xb7   :  { %3939 = vmatprep.mubr.msk.bf16.mxu1 %vm941_vm0, %v4096_v29 }
  0xba   :  { %3808 = vmatmul.mubr.msk.bf16.gmra.mrb[88].mxu0 %vm941_vm0, %v4067_v26 }
  0xbb   :  { %3811 = vmatprep.mubr.msk.bf16.mxu0 %vm941_vm0, %v4070_v27 }
  0xbe   :  { %3940 = vmatmul.mubr.msk.bf16.gmra.mrb[88].mxu1 %vm941_vm0, %v4097_v32 }
  0xbf   :  { %3943 = vmatprep.mubr.msk.bf16.mxu1 %vm941_vm0, %v4100_v33 }
  0xc2   :  { %3812 = vmatmul.mubr.msk.bf16.gmra.mrb[92].mxu0 %vm941_vm0, %v4071_v30 }
  0xc3   :  { %3815 = vmatprep.mubr.msk.bf16.mxu0 %vm941_vm0, %v4074_v31 }
  0xc6   :  { %3944 = vmatmul.mubr.msk.bf16.gmra.mrb[92].mxu1 %vm941_vm0, %v4101_v37 }
  0xc7   :  { %3947 = vmatprep.mubr.msk.bf16.mxu1 %vm941_vm0, %v4104_v39 }
  0xca   :  { %3816 = vmatmul.mubr.msk.bf16.gmra.mrb[96].mxu0 %vm941_vm0, %v4075_v34  ;;  %v4095_v34 = vld [vmem:[%s5511_s0 + $0x1d8] sm:$0xff]  }
  0xcb   :  { %3819 = vmatprep.mubr.msk.bf16.mxu0 %vm941_vm0, %v4078_v35 }
  0xce   :  { %3948 = vmatmul.mubr.msk.bf16.gmra.mrb[96].mxu1 %vm941_vm0, %v4105_v42 }
  0xcf   :  { %3951 = vmatprep.mubr.msk.bf16.mxu1 %vm941_vm0, %v4108_v43 }
  0xd2   :  { %3820 = vmatmul.mubr.msk.bf16.gmra.mrb[100].mxu0 %vm941_vm0, %v4079_v40  ;;  %v4098_v40 = vld [vmem:[%s5511_s0 + $0x1e0] sm:$0xff]  }
  0xd3   :  { %3823 = vmatprep.mubr.msk.bf16.mxu0 %vm941_vm0, %v4082_v41 }
  0xd6   :  { %3952 = vmatmul.mubr.msk.bf16.gmra.mrb[100].mxu1 %vm941_vm0, %v4109_v46 }
  0xd7   :  { %3955 = vmatprep.mubr.msk.bf16.mxu1 %vm941_vm0, %v4110_v47 }
  0xda   :  { %3824 = vmatmul.mubr.msk.bf16.gmra.mrb[104].mxu0 %vm941_vm0, %v4083_v44 }
  0xdb   :  { %3827 = vmatprep.mubr.msk.bf16.mxu0 %vm941_vm0, %v4086_v45 }
  0xdd   :  { %v3721_v49 = vpop.f32.mrb[0].mxu0  ;;  %v4660_v14 = vpop.f32.mrb[0].mxu1 }
  0xde   :  { %v1360_v50 = vpop.f32.mrb[1].mxu0  ;;  %v1369_v52 = vadd.f32 %v3721_v49, %v4625_v48  ;;  %3956 = vmatmul.mubr.msk.bf16.gmra.mrb[104].mxu1 %vm941_vm0, %v4111_v60  ;;  %v4668_v20 = vpop.f32.mrb[1].mxu1  ;;  %v4115_v49 = vld [vmem:[%s5511_s0 + $0x3d8] sm:$0xff]  }
  0xdf   :  { %v1361_v53 = vadd.f32 %v4625_v48, %v1360_v50  ;;  %v3722_v54 = vpop.f32.mrb[2].mxu0  ;;  %3959 = vmatprep.mubr.msk.bf16.mxu1 %vm941_vm0, %v4112_v61  ;;  %v4671_v22 = vpop.f32.mrb[2].mxu1 }
  0xe0   :  { %v1363_v56 = vpop.f32.mrb[3].mxu0  ;;  %v1372_v58 = vadd.f32 %v3722_v54, %v4625_v48  ;;  %v2385_v62 = vmax.f32 %v1369_v52, 0.0  ;;  %v4678_v27 = vpop.f32.mrb[3].mxu1 }
  0xe1   :  { %v2383_v57 = vmax.f32 %v1361_v53, 0.0  ;;  %v1364_v59 = vadd.f32 %v4625_v48, %v1363_v56  ;;  %v4116_v53 = vld [vmem:[%s5511_s0 + $0x3e0] sm:$0xff]  }
  0xe2   :  { %3828 = vmatmul.mubr.msk.bf16.gmra.mrb[108].mxu0 %vm941_vm0, %v4087_v51  ;;  %v2386_v1 = vmax.f32 %v1372_v58, 0.0  ;;  %v2642_v7 = vsel %vm941_vm0, %v2385_v62, 0.0 }
  0xe3   :  { %v2384_v63 = vmax.f32 %v1364_v59, 0.0  ;;  %3831 = vmatprep.mubr.msk.bf16.mxu0 %vm941_vm0, %v4090_v55  ;;  %v2639_v0 = vsel %vm941_vm0, %v2383_v57, 0.0 }
  0xe4   :  { %v2644_v15 = vsel %vm941_vm0, %v2386_v1, 0.0 }
  0xe5   :  { %v2640_v2 = vsel %vm941_vm0, %v2384_v63, 0.0  ;;  %v3725_v3 = vpop.f32.mrb[4].mxu0  ;;  %v4692_v43 = vpop.f32.mrb[4].mxu1 }
  0xe6   :  { %v2641_v4 = vadd.f32 %v2640_v2, %v2639_v0  ;;  %v1376_v5 = vpop.f32.mrb[5].mxu0  ;;  %v1385_v8 = vadd.f32 %v3725_v3, %v4625_v48  ;;  %3960 = vmatmul.mubr.msk.bf16.gmra.mrb[108].mxu1 %vm941_vm0, %v4113_v19  ;;  %v4700_v50 = vpop.f32.mrb[5].mxu1  ;;  %v4099_v0 = vld [vmem:[%s5511_s0 + $0x1e8] sm:$0xff]  }
  0xe7   :  { %v1377_v9 = vadd.f32 %v4625_v48, %v1376_v5  ;;  %v3726_v10 = vpop.f32.mrb[6].mxu0  ;;  %3963 = vmatprep.mubr.msk.bf16.mxu1 %vm941_vm0, %v4114_v23  ;;  %v4703_v52 = vpop.f32.mrb[6].mxu1  ;;  %v4102_v5 = vld [vmem:[%s5511_s0 + $0x1f0] sm:$0xff]  }
  0xe8   :  { %v2643_v12 = vadd.f32 %v2642_v7, %v2641_v4  ;;  %v1379_v13 = vpop.f32.mrb[7].mxu0  ;;  %v1388_v17 = vadd.f32 %v3726_v10, %v4625_v48  ;;  %v2389_v24 = vmax.f32 %v1385_v8, 0.0  ;;  %v4710_v57 = vpop.f32.mrb[7].mxu1 }
  0xe9   :  { %v2387_v16 = vmax.f32 %v1377_v9, 0.0  ;;  %v1380_v18 = vadd.f32 %v4625_v48, %v1379_v13  ;;  %v4117_v13 = vld [vmem:[%s5511_s0 + $0x3e8] sm:$0xff]  }
  0xea   :  { %v2645_v21 = vadd.f32 %v2644_v15, %v2643_v12  ;;  %3832 = vmatmul.mubr.msk.bf16.gmra.mrb[112].mxu0 %vm941_vm0, %v4091_v6  ;;  %v2390_v29 = vmax.f32 %v1388_v17, 0.0  ;;  %v2650_v35 = vsel %vm941_vm0, %v2389_v24, 0.0 }
  0xeb   :  { %v2646_v25 = vsel %vm941_vm0, %v2387_v16, 0.0  ;;  %v2388_v26 = vmax.f32 %v1380_v18, 0.0  ;;  %3835 = vmatprep.mubr.msk.bf16.mxu0 %vm941_vm0, %v4094_v11  ;;  %v4118_v18 = vld [vmem:[%s5511_s0 + $0x3f0] sm:$0xff]  }
  0xec   :  { %v2647_v28 = vadd.f32 %v2646_v25, %v2645_v21  ;;  %v2652_v44 = vsel %vm941_vm0, %v2390_v29, 0.0 }
  0xed   :  { %v2648_v30 = vsel %vm941_vm0, %v2388_v26, 0.0  ;;  %v3729_v31 = vpop.f32.mrb[8].mxu0  ;;  %v4724_v8 = vpop.f32.mrb[8].mxu1 }
  0xee   :  { %v2649_v32 = vadd.f32 %v2648_v30, %v2647_v28  ;;  %v1392_v33 = vpop.f32.mrb[9].mxu0  ;;  %v1401_v36 = vadd.f32 %v3729_v31, %v4625_v48  ;;  %3964 = vmatmul.mubr.msk.bf16.gmra.mrb[112].mxu1 %vm941_vm0, %v4115_v49  ;;  %v4732_v15 = vpop.f32.mrb[9].mxu1 }
  0xef   :  { %v1393_v37 = vadd.f32 %v4625_v48, %v1392_v33  ;;  %v3730_v39 = vpop.f32.mrb[10].mxu0  ;;  %3967 = vmatprep.mubr.msk.bf16.mxu1 %vm941_vm0, %v4116_v53  ;;  %v4735_v17 = vpop.f32.mrb[10].mxu1 }
  0xf0   :  { %v2651_v41 = vadd.f32 %v2650_v35, %v2649_v32  ;;  %v1395_v42 = vpop.f32.mrb[11].mxu0  ;;  %v1404_v46 = vadd.f32 %v3730_v39, %v4625_v48  ;;  %v2393_v54 = vmax.f32 %v1401_v36, 0.0  ;;  %v4742_v24 = vpop.f32.mrb[11].mxu1  ;;  %v4103_v32 = vld [vmem:[%s5511_s0 + $0x1f8] sm:$0xff]  }
  0xf1   :  { %v2391_v45 = vmax.f32 %v1393_v37, 0.0  ;;  %v1396_v47 = vadd.f32 %v4625_v48, %v1395_v42  ;;  %v4106_v37 = vld [vmem:[%s5511_s0 + $0x200] sm:$0xff]  }
  0xf2   :  { %v2653_v51 = vadd.f32 %v2652_v44, %v2651_v41  ;;  %3836 = vmatmul.mubr.msk.bf16.gmra.mrb[116].mxu0 %vm941_vm0, %v4095_v34  ;;  %v2394_v59 = vmax.f32 %v1404_v46, 0.0  ;;  %v2658_v1 = vsel %vm941_vm0, %v2393_v54, 0.0 }
  0xf3   :  { %v2654_v55 = vsel %vm941_vm0, %v2391_v45, 0.0  ;;  %v2392_v56 = vmax.f32 %v1396_v47, 0.0  ;;  %3839 = vmatprep.mubr.msk.bf16.mxu0 %vm941_vm0, %v4098_v40  ;;  %v4119_v47 = vld [vmem:[%s5511_s0 + $0x3f8] sm:$0xff]  }
  0xf4   :  { %v2655_v58 = vadd.f32 %v2654_v55, %v2653_v51  ;;  %v2660_v9 = vsel %vm941_vm0, %v2394_v59, 0.0 }
  0xf5   :  { %v2656_v60 = vsel %vm941_vm0, %v2392_v56, 0.0  ;;  %v3733_v61 = vpop.f32.mrb[12].mxu0  ;;  %v4756_v41 = vpop.f32.mrb[12].mxu1 }
  0xf6   :  { %v2657_v62 = vadd.f32 %v2656_v60, %v2655_v58  ;;  %v1408_v63 = vpop.f32.mrb[13].mxu0  ;;  %v1417_v2 = vadd.f32 %v3733_v61, %v4625_v48  ;;  %3968 = vmatmul.mubr.msk.bf16.gmra.mrb[116].mxu1 %vm941_vm0, %v4117_v13  ;;  %v4764_v49 = vpop.f32.mrb[13].mxu1 }
  0xf7   :  { %v1409_v3 = vadd.f32 %v4625_v48, %v1408_v63  ;;  %v3734_v4 = vpop.f32.mrb[14].mxu0  ;;  %3971 = vmatprep.mubr.msk.bf16.mxu1 %vm941_vm0, %v4118_v18  ;;  %v4767_v53 = vpop.f32.mrb[14].mxu1 }
  0xf8   :  { %v2659_v6 = vadd.f32 %v2658_v1, %v2657_v62  ;;  %v1411_v7 = vpop.f32.mrb[15].mxu0  ;;  %v1420_v11 = vadd.f32 %v3734_v4, %v4625_v48  ;;  %v2397_v19 = vmax.f32 %v1417_v2, 0.0  ;;  %v4771_v58 = vpop.f32.mrb[15].mxu1  ;;  %v4107_v1 = vld [vmem:[%s5511_s0 + $0x208] sm:$0xff]  }
  0xf9   :  { %v2395_v10 = vmax.f32 %v1409_v3, 0.0  ;;  %v1412_v12 = vadd.f32 %v4625_v48, %v1411_v7 }
  0xfa   :  { %v2661_v16 = vadd.f32 %v2660_v9, %v2659_v6  ;;  %3840 = vmatmul.mubr.msk.bf16.gmra.mrb[120].mxu0 %vm941_vm0, %v4099_v0  ;;  %v2398_v26 = vmax.f32 %v1420_v11, 0.0  ;;  %v2666_v33 = vsel %vm941_vm0, %v2397_v19, 0.0 }
  0xfb   :  { %v2662_v21 = vsel %vm941_vm0, %v2395_v10, 0.0  ;;  %v2396_v23 = vmax.f32 %v1412_v12, 0.0  ;;  %3843 = vmatprep.mubr.msk.bf16.mxu0 %vm941_vm0, %v4102_v5 }
  0xfc   :  { %v2663_v25 = vadd.f32 %v2662_v21, %v2661_v16  ;;  %v2668_v42 = vsel %vm941_vm0, %v2398_v26, 0.0 }
  0xfd   :  { %v2664_v28 = vsel %vm941_vm0, %v2396_v23, 0.0  ;;  %v3737_v29 = vpop.f32.mrb[16].mxu0  ;;  %v4781_v9 = vpop.f32.mrb[16].mxu1 }
  0xfe   :  { %v2665_v30 = vadd.f32 %v2664_v28, %v2663_v25  ;;  %v1424_v31 = vpop.f32.mrb[17].mxu0  ;;  %v1433_v34 = vadd.f32 %v3737_v29, %v4625_v48  ;;  %3972 = vmatmul.mubr.msk.bf16.gmra.mrb[120].mxu1 %vm941_vm0, %v4119_v47  ;;  %v4786_v16 = vpop.f32.mrb[17].mxu1 }
  0xff   :  { %v1425_v35 = vadd.f32 %v4625_v48, %v1424_v31  ;;  %v3738_v36 = vpop.f32.mrb[18].mxu0  ;;  %v4789_v19 = vpop.f32.mrb[18].mxu1 }
 0x100   :  { %v2667_v39 = vadd.f32 %v2666_v33, %v2665_v30  ;;  %v1427_v40 = vpop.f32.mrb[19].mxu0  ;;  %v1436_v45 = vadd.f32 %v3738_v36, %v4625_v48  ;;  %v2401_v54 = vmax.f32 %v1433_v34, 0.0  ;;  %v4792_v26 = vpop.f32.mrb[19].mxu1 }
 0x101   :  { %v2399_v44 = vmax.f32 %v1425_v35, 0.0  ;;  %v1428_v46 = vadd.f32 %v4625_v48, %v1427_v40 }
 0x102   :  { %v2669_v51 = vadd.f32 %v2668_v42, %v2667_v39  ;;  %3844 = vmatmul.mubr.msk.bf16.gmra.mrb[124].mxu0 %vm941_vm0, %v4103_v32  ;;  %v2402_v60 = vmax.f32 %v1436_v45, 0.0  ;;  %v2674_v2 = vsel %vm941_vm0, %v2401_v54, 0.0 }
 0x103   :  { %v2670_v55 = vsel %vm941_vm0, %v2399_v44, 0.0  ;;  %v2400_v56 = vmax.f32 %v1428_v46, 0.0  ;;  %3847 = vmatprep.mubr.msk.bf16.mxu0 %vm941_vm0, %v4106_v37 }
 0x104   :  { %v2671_v59 = vadd.f32 %v2670_v55, %v2669_v51  ;;  %v2676_v10 = vsel %vm941_vm0, %v2402_v60, 0.0 }
 0x105   :  { %v2672_v61 = vsel %vm941_vm0, %v2400_v56, 0.0  ;;  %v3741_v62 = vpop.f32.mrb[20].mxu0  ;;  %v4798_v42 = vpop.f32.mrb[20].mxu1 }
 0x106   :  { %v2673_v63 = vadd.f32 %v2672_v61, %v2671_v59  ;;  %v1440_v0 = vpop.f32.mrb[21].mxu0  ;;  %v1449_v3 = vadd.f32 %v3741_v62, %v4625_v48  ;;  %v4803_v51 = vpop.f32.mrb[21].mxu1 }
 0x107   :  { %v1441_v4 = vadd.f32 %v4625_v48, %v1440_v0  ;;  %v3742_v5 = vpop.f32.mrb[22].mxu0  ;;  %v4805_v55 = vpop.f32.mrb[22].mxu1 }
 0x108   :  { %v2675_v6 = vadd.f32 %v2674_v2, %v2673_v63  ;;  %v1443_v7 = vpop.f32.mrb[23].mxu0  ;;  %v1452_v12 = vadd.f32 %v3742_v5, %v4625_v48  ;;  %v2405_v21 = vmax.f32 %v1449_v3, 0.0  ;;  %v4808_v61 = vpop.f32.mrb[23].mxu1 }
 0x109   :  { %v2403_v11 = vmax.f32 %v1441_v4, 0.0  ;;  %v1444_v13 = vadd.f32 %v4625_v48, %v1443_v7 }
 0x10a   :  { %v2677_v18 = vadd.f32 %v2676_v10, %v2675_v6  ;;  %3848 = vmatmul.mubr.msk.bf16.gmra.mrb[128].mxu0 %vm941_vm0, %v4107_v1  ;;  %v2406_v29 = vmax.f32 %v1452_v12, 0.0  ;;  %v2682_v34 = vsel %vm941_vm0, %v2405_v21, 0.0 }
 0x10b   :  { %v2678_v23 = vsel %vm941_vm0, %v2403_v11, 0.0  ;;  %v2404_v25 = vmax.f32 %v1444_v13, 0.0 }
 0x10c   :  { %v2679_v28 = vadd.f32 %v2678_v23, %v2677_v18  ;;  %v2684_v44 = vsel %vm941_vm0, %v2406_v29, 0.0 }
 0x10d   :  { %v2680_v30 = vsel %vm941_vm0, %v2404_v25, 0.0  ;;  %v3745_v31 = vpop.f32.mrb[24].mxu0  ;;  %v4814_v12 = vpop.f32.mrb[24].mxu1 }
 0x10e   :  { %v2681_v32 = vadd.f32 %v2680_v30, %v2679_v28  ;;  %v1456_v33 = vpop.f32.mrb[25].mxu0  ;;  %v1465_v35 = vadd.f32 %v3745_v31, %v4625_v48  ;;  %5520 = vst [vmem:[#allocation5_spill] sm:$0xff] %v4814_v12  ;;  %v4819_v25 = vpop.f32.mrb[25].mxu1 }
 0x10f   :  { %v1457_v36 = vadd.f32 %v4625_v48, %v1456_v33  ;;  %v3746_v37 = vpop.f32.mrb[26].mxu0  ;;  %5521 = vst [vmem:[#allocation6_spill] sm:$0xff] %v4819_v25  ;;  %v4821_v29 = vpop.f32.mrb[26].mxu1 }
 0x110   :  { %v2683_v39 = vadd.f32 %v2682_v34, %v2681_v32  ;;  %v1459_v40 = vpop.f32.mrb[27].mxu0  ;;  %v1468_v46 = vadd.f32 %v3746_v37, %v4625_v48  ;;  %v2409_v56 = vmax.f32 %v1465_v35, 0.0  ;;  %5522 = vst [vmem:[#allocation7_spill] sm:$0xff] %v4821_v29  ;;  %v4824_v33 = vpop.f32.mrb[27].mxu1 }
 0x111   :  { %v2407_v45 = vmax.f32 %v1457_v36, 0.0  ;;  %v1460_v47 = vadd.f32 %v4625_v48, %v1459_v40  ;;  %5523 = vst [vmem:[#allocation8_spill] sm:$0xff] %v4824_v33 }
 0x112   :  { %v2685_v54 = vadd.f32 %v2684_v44, %v2683_v39  ;;  %v2410_v63 = vmax.f32 %v1468_v46, 0.0  ;;  %v2690_v4 = vsel %vm941_vm0, %v2409_v56, 0.0 }
 0x113   :  { %v2686_v59 = vsel %vm941_vm0, %v2407_v45, 0.0  ;;  %v2408_v60 = vmax.f32 %v1460_v47, 0.0 }
 0x114   :  { %v2687_v62 = vadd.f32 %v2686_v59, %v2685_v54  ;;  %v2692_v13 = vsel %vm941_vm0, %v2410_v63, 0.0 }
 0x115   :  { %v2688_v0 = vsel %vm941_vm0, %v2408_v60, 0.0  ;;  %v3749_v1 = vpop.f32.mrb[28].mxu0  ;;  %v3881_v60 = vpop.f32.mrb[28].mxu1 }
 0x116   :  { %v2689_v2 = vadd.f32 %v2688_v0, %v2687_v62  ;;  %v1472_v3 = vpop.f32.mrb[29].mxu0  ;;  %v1481_v5 = vadd.f32 %v3749_v1, %v4625_v48 }
 0x117   :  { %v1473_v6 = vadd.f32 %v4625_v48, %v1472_v3  ;;  %v3750_v7 = vpop.f32.mrb[30].mxu0 }
 0x118   :  { %v2691_v10 = vadd.f32 %v2690_v4, %v2689_v2  ;;  %v1475_v11 = vpop.f32.mrb[31].mxu0  ;;  %v1484_v21 = vadd.f32 %v3750_v7, %v4625_v48  ;;  %v2413_v30 = vmax.f32 %v1481_v5, 0.0  ;;  %v2000_v2 = vpop.f32.mrb[29].mxu1  ;;  %v2009_v4 = vadd.f32 %v3881_v60, %v4625_v48 }
 0x119   :  { %v2411_v18 = vmax.f32 %v1473_v6, 0.0  ;;  %v1476_v23 = vadd.f32 %v4625_v48, %v1475_v11  ;;  %v2001_v5 = vadd.f32 %v4625_v48, %v2000_v2  ;;  %v3882_v6 = vpop.f32.mrb[30].mxu1 }
 0x11a   :  { %v2693_v28 = vadd.f32 %v2692_v13, %v2691_v10  ;;  %v2414_v35 = vmax.f32 %v1484_v21, 0.0  ;;  %v2698_v45 = vsel %vm941_vm0, %v2413_v30, 0.0  ;;  %v2012_v11 = vadd.f32 %v3882_v6, %v4625_v48  ;;  %v2003_v13 = vpop.f32.mrb[31].mxu1 }
 0x11b   :  { %v2694_v31 = vsel %vm941_vm0, %v2411_v18, 0.0  ;;  %v2412_v32 = vmax.f32 %v1476_v23, 0.0  ;;  %v2543_v21 = vmax.f32 %v2001_v5, 0.0  ;;  %v2004_v23 = vadd.f32 %v4625_v48, %v2003_v13 }
 0x11c   :  { %v2695_v34 = vadd.f32 %v2694_v31, %v2693_v28  ;;  %v2700_v62 = vsel %vm941_vm0, %v2414_v35, 0.0 }
 0x11d   :  { %v2696_v36 = vsel %vm941_vm0, %v2412_v32, 0.0  ;;  %v3753_v37 = vpop.f32.mrb[32].mxu0 }
 0x11e   :  { %v2697_v39 = vadd.f32 %v2696_v36, %v2695_v34  ;;  %v1497_v40 = vadd.f32 %v3753_v37, %v4625_v48  ;;  %v1488_v44 = vpop.f32.mrb[33].mxu0 }
 0x11f   :  { %v1489_v46 = vadd.f32 %v4625_v48, %v1488_v44  ;;  %v3754_v47 = vpop.f32.mrb[34].mxu0 }
 0x120   :  { %v2699_v54 = vadd.f32 %v2698_v45, %v2697_v39  ;;  %v1500_v56 = vadd.f32 %v3754_v47, %v4625_v48  ;;  %v1491_v59 = vpop.f32.mrb[35].mxu0  ;;  %v2417_v63 = vmax.f32 %v1497_v40, 0.0  ;;  %v2545_v39 = vmax.f32 %v2009_v4, 0.0 }
 0x121   :  { %v2415_v0 = vmax.f32 %v1489_v46, 0.0  ;;  %v1492_v1 = vadd.f32 %v4625_v48, %v1491_v59  ;;  %v2546_v46 = vmax.f32 %v2012_v11, 0.0  ;;  %v2544_v47 = vmax.f32 %v2004_v23, 0.0 }
 0x122   :  { %v2701_v3 = vadd.f32 %v2700_v62, %v2699_v54  ;;  %v2418_v7 = vmax.f32 %v1500_v56, 0.0  ;;  %v2711_v28 = vsel %vm941_vm0, %v2417_v63, 0.0  ;;  %v2984_v62 = vsel %vm941_vm0, %v2543_v21, 0.0  ;;  %v3885_v63 = vpop.f32.mrb[32].mxu1 }
 0x123   :  { %v2416_v10 = vmax.f32 %v1492_v1, 0.0  ;;  %v2708_v30 = vsel %vm941_vm0, %v2415_v0, 0.0  ;;  %v2016_v4 = vpop.f32.mrb[33].mxu1  ;;  %v2987_v6 = vsel %vm941_vm0, %v2545_v39, 0.0 }
 0x124   :  { %v2702_v18 = vrot.slane %v2701_v3, 4  ;;  %v2713_v40 = vsel %vm941_vm0, %v2418_v7, 0.0  ;;  %v2025_v7 = vadd.f32 %v3885_v63, %v4625_v48 }
 0x125   :  { %v2709_v31 = vsel %vm941_vm0, %v2416_v10, 0.0  ;;  %v3757_v32 = vpop.f32.mrb[36].mxu0  ;;  %v3886_v10 = vpop.f32.mrb[34].mxu1 }
 0x126   :  { %v2703_v34 = vadd.f32 %v2702_v18, %v2701_v3  ;;  %v2710_v35 = vadd.f32 %v2709_v31, %v2708_v30  ;;  %v1513_v36 = vadd.f32 %v3757_v32, %v4625_v48  ;;  %v1504_v37 = vpop.f32.mrb[37].mxu0  ;;  %v2985_v3 = vsel %vm941_vm0, %v2544_v47, 0.0  ;;  %v2019_v23 = vpop.f32.mrb[35].mxu1 }
 0x127   :  { %v1505_v44 = vadd.f32 %v4625_v48, %v1504_v37  ;;  %v3758_v45 = vpop.f32.mrb[38].mxu0  ;;  %v2989_v18 = vsel %vm941_vm0, %v2546_v46, 0.0  ;;  %v2986_v21 = vadd.f32 %v2985_v3, %v2984_v62  ;;  %v2017_v32 = vadd.f32 %v4625_v48, %v2016_v4  ;;  %v3889_v3 = vpop.f32.mrb[36].mxu1 }
 0x128   :  { %v2704_v54 = vrot.slane %v2703_v34, 2  ;;  %v2712_v56 = vadd.f32 %v2711_v28, %v2710_v35  ;;  %v2421_v59 = vmax.f32 %v1513_v36, 0.0  ;;  %v1507_v60 = vpop.f32.mrb[39].mxu0  ;;  %v1516_v1 = vadd.f32 %v3758_v45, %v4625_v48 }
 0x129   :  { %v2419_v0 = vmax.f32 %v1505_v44, 0.0  ;;  %v1508_v2 = vadd.f32 %v4625_v48, %v1507_v60  ;;  %v2988_v39 = vadd.f32 %v2987_v6, %v2986_v21  ;;  %v2549_v47 = vmax.f32 %v2025_v7, 0.0 }
 0x12a   :  { %v2714_v5 = vadd.f32 %v2713_v40, %v2712_v56  ;;  %v4851_v28 = vadd.f32 %v2704_v54, %v2703_v34  ;;  %v2719_v30 = vsel %vm941_vm0, %v2421_v59, 0.0  ;;  %v2422_v35 = vmax.f32 %v1516_v1, 0.0 }
 0x12b   :  { %v2715_v11 = vsel %vm941_vm0, %v2419_v0, 0.0  ;;  %v2420_v13 = vmax.f32 %v1508_v2, 0.0  ;;  %v2028_v40 = vadd.f32 %v3886_v10, %v4625_v48  ;;  %v2547_v56 = vmax.f32 %v2017_v32, 0.0  ;;  %v2032_v10 = vpop.f32.mrb[37].mxu1 }
 0x12c   :  { %v2716_v31 = vadd.f32 %v2715_v11, %v2714_v5  ;;  %v2990_v59 = vadd.f32 %v2989_v18, %v2988_v39  ;;  %v2020_v62 = vadd.f32 %v4625_v48, %v2019_v23  ;;  %v2721_v4 = vsel %vm941_vm0, %v2422_v35, 0.0  ;;  %v3890_v23 = vpop.f32.mrb[38].mxu1 }
 0x12d   :  { %v2717_v36 = vsel %vm941_vm0, %v2420_v13, 0.0  ;;  %v3761_v37 = vpop.f32.mrb[40].mxu0  ;;  %v2550_v60 = vmax.f32 %v2028_v40, 0.0  ;;  %v2991_v7 = vsel %vm941_vm0, %v2547_v56, 0.0  ;;  %v2706_v11 = vrot.slane %v4851_v28, 1  ;;  %v2035_v35 = vpop.f32.mrb[39].mxu1 }
 0x12e   :  { %v2718_v44 = vadd.f32 %v2717_v36, %v2716_v31  ;;  %v1529_v45 = vadd.f32 %v3761_v37, %v4625_v48  ;;  %v1520_v46 = vpop.f32.mrb[41].mxu0  ;;  %v2995_v18 = vsel %vm941_vm0, %v2549_v47, 0.0  ;;  %v2992_v32 = vadd.f32 %v2991_v7, %v2990_v59 }
 0x12f   :  { %v1521_v34 = vadd.f32 %v4625_v48, %v1520_v46  ;;  %v3762_v54 = vpop.f32.mrb[42].mxu0  ;;  %v2997_v21 = vsel %vm941_vm0, %v2550_v60, 0.0  ;;  %v2548_v36 = vmax.f32 %v2020_v62, 0.0  ;;  %v2033_v56 = vadd.f32 %v4625_v48, %v2032_v10 }
 0x130   :  { %v2720_v63 = vadd.f32 %v2719_v30, %v2718_v44  ;;  %v2425_v0 = vmax.f32 %v1529_v45, 0.0  ;;  %v1532_v1 = vadd.f32 %v3762_v54, %v4625_v48  ;;  %v1523_v2 = vpop.f32.mrb[43].mxu0  ;;  %v2041_v44 = vadd.f32 %v3889_v3, %v4625_v48 }
 0x131   :  { %v2423_v5 = vmax.f32 %v1521_v34, 0.0  ;;  %v1524_v6 = vadd.f32 %v4625_v48, %v1523_v2  ;;  %v2993_v47 = vsel %vm941_vm0, %v2548_v36, 0.0  ;;  %v2044_v34 = vadd.f32 %v3890_v23, %v4625_v48  ;;  %v3893_v23 = vpop.f32.mrb[40].mxu1 }
 0x132   :  { %v2722_v13 = vadd.f32 %v2721_v4, %v2720_v63  ;;  %v2727_v37 = vsel %vm941_vm0, %v2425_v0, 0.0  ;;  %v2426_v40 = vmax.f32 %v1532_v1, 0.0  ;;  %v2994_v62 = vadd.f32 %v2993_v47, %v2992_v32 }
 0x133   :  { %v2723_v30 = vsel %vm941_vm0, %v2423_v5, 0.0  ;;  %v2424_v31 = vmax.f32 %v1524_v6, 0.0  ;;  %v2553_v63 = vmax.f32 %v2041_v44, 0.0  ;;  %v2551_v2 = vmax.f32 %v2033_v56, 0.0 }
 0x134   :  { %v2724_v39 = vadd.f32 %v2723_v30, %v2722_v13  ;;  %v2554_v3 = vmax.f32 %v2044_v34, 0.0  ;;  %v2036_v4 = vadd.f32 %v4625_v48, %v2035_v35  ;;  %v2996_v13 = vadd.f32 %v2995_v18, %v2994_v62 }
 0x135   :  { %v2725_v45 = vsel %vm941_vm0, %v2424_v31, 0.0  ;;  %v3765_v46 = vpop.f32.mrb[44].mxu0  ;;  %v2729_v30 = vsel %vm941_vm0, %v2426_v40, 0.0  ;;  %v2999_v36 = vsel %vm941_vm0, %v2551_v2, 0.0  ;;  %v3003_v35 = vsel %vm941_vm0, %v2553_v63, 0.0 }
 0x136   :  { %v2726_v54 = vadd.f32 %v2725_v45, %v2724_v39  ;;  %v1545_v59 = vadd.f32 %v3765_v46, %v4625_v48  ;;  %v1536_v60 = vpop.f32.mrb[45].mxu0  ;;  %v2048_v39 = vpop.f32.mrb[41].mxu1  ;;  %v2552_v34 = vmax.f32 %v2036_v4, 0.0  ;;  %v2057_v62 = vadd.f32 %v3893_v23, %v4625_v48 }
 0x137   :  { %v1537_v0 = vadd.f32 %v4625_v48, %v1536_v60  ;;  %v3766_v1 = vpop.f32.mrb[46].mxu0  ;;  %v3894_v46 = vpop.f32.mrb[42].mxu1  ;;  %v3005_v60 = vsel %vm941_vm0, %v2554_v3, 0.0 }
 0x138   :  { %v2728_v5 = vadd.f32 %v2727_v37, %v2726_v54  ;;  %v2429_v6 = vmax.f32 %v1545_v59, 0.0  ;;  %v1548_v7 = vadd.f32 %v3766_v1, %v4625_v48  ;;  %v1539_v10 = vpop.f32.mrb[47].mxu0  ;;  %v2998_v37 = vadd.f32 %v2997_v21, %v2996_v13  ;;  %v2051_v54 = vpop.f32.mrb[43].mxu1 }
 0x139   :  { %v2427_v31 = vmax.f32 %v1537_v0, 0.0  ;;  %v1540_v32 = vadd.f32 %v4625_v48, %v1539_v10  ;;  %v3001_v2 = vsel %vm941_vm0, %v2552_v34, 0.0  ;;  %v2049_v21 = vadd.f32 %v4625_v48, %v2048_v39 }
 0x13a   :  { %v2735_v44 = vsel %vm941_vm0, %v2429_v6, 0.0  ;;  %v2730_v45 = vadd.f32 %v2729_v30, %v2728_v5  ;;  %v2430_v56 = vmax.f32 %v1548_v7, 0.0  ;;  %v3000_v59 = vadd.f32 %v2999_v36, %v2998_v37 }
 0x13b   :  { %v2731_v47 = vsel %vm941_vm0, %v2427_v31, 0.0  ;;  %v2428_v18 = vmax.f32 %v1540_v32, 0.0  ;;  %v2060_v63 = vadd.f32 %v3894_v46, %v4625_v48  ;;  %v2557_v10 = vmax.f32 %v2057_v62, 0.0  ;;  %v3897_v46 = vpop.f32.mrb[44].mxu1 }
 0x13c   :  { %v2732_v40 = vadd.f32 %v2731_v47, %v2730_v45  ;;  %v3002_v7 = vadd.f32 %v3001_v2, %v3000_v59  ;;  %v2555_v30 = vmax.f32 %v2049_v21, 0.0  ;;  %v2052_v31 = vadd.f32 %v4625_v48, %v2051_v54  ;;  %v2064_v59 = vpop.f32.mrb[45].mxu1 }
 0x13d   :  { %v2733_v0 = vsel %vm941_vm0, %v2428_v18, 0.0  ;;  %v3769_v1 = vpop.f32.mrb[48].mxu0  ;;  %v2558_v23 = vmax.f32 %v2060_v63, 0.0  ;;  %v2737_v47 = vsel %vm941_vm0, %v2430_v56, 0.0  ;;  %v3011_v54 = vsel %vm941_vm0, %v2557_v10, 0.0 }
 0x13e   :  { %v2734_v5 = vadd.f32 %v2733_v0, %v2732_v40  ;;  %v1561_v6 = vadd.f32 %v3769_v1, %v4625_v48  ;;  %v1552_v4 = vpop.f32.mrb[49].mxu0  ;;  %v3004_v37 = vadd.f32 %v3003_v35, %v3002_v7  ;;  %v3007_v40 = vsel %vm941_vm0, %v2555_v30, 0.0  ;;  %v3898_v1 = vpop.f32.mrb[46].mxu1 }
 0x13f   :  { %v1553_v13 = vadd.f32 %v4625_v48, %v1552_v4  ;;  %v3770_v3 = vpop.f32.mrb[50].mxu0  ;;  %v2556_v63 = vmax.f32 %v2052_v31, 0.0  ;;  %v3013_v4 = vsel %vm941_vm0, %v2558_v23, 0.0  ;;  %v2073_v7 = vadd.f32 %v3897_v46, %v4625_v48 }
 0x140   :  { %v2736_v32 = vadd.f32 %v2735_v44, %v2734_v5  ;;  %v2433_v36 = vmax.f32 %v1561_v6, 0.0  ;;  %v1564_v45 = vadd.f32 %v3770_v3, %v4625_v48  ;;  %v1555_v39 = vpop.f32.mrb[51].mxu0  ;;  %v3006_v44 = vadd.f32 %v3005_v60, %v3004_v37  ;;  %v2067_v5 = vpop.f32.mrb[47].mxu1 }
 0x141   :  { %v2431_v18 = vmax.f32 %v1553_v13, 0.0  ;;  %v1556_v34 = vadd.f32 %v4625_v48, %v1555_v39  ;;  %v3009_v30 = vsel %vm941_vm0, %v2556_v63, 0.0  ;;  %v2065_v60 = vadd.f32 %v4625_v48, %v2064_v59 }
 0x142   :  { %v2743_v62 = vsel %vm941_vm0, %v2433_v36, 0.0  ;;  %v2738_v0 = vadd.f32 %v2737_v47, %v2736_v32  ;;  %v2434_v21 = vmax.f32 %v1564_v45, 0.0  ;;  %v3008_v6 = vadd.f32 %v3007_v40, %v3006_v44 }
 0x143   :  { %v2739_v2 = vsel %vm941_vm0, %v2431_v18, 0.0  ;;  %v2432_v35 = vmax.f32 %v1556_v34, 0.0  ;;  %v2076_v10 = vadd.f32 %v3898_v1, %v4625_v48  ;;  %v2561_v39 = vmax.f32 %v2073_v7, 0.0  ;;  %v3901_v1 = vpop.f32.mrb[48].mxu1 }
 0x144   :  { %v2740_v56 = vadd.f32 %v2739_v2, %v2738_v0  ;;  %v3010_v45 = vadd.f32 %v3009_v30, %v3008_v6  ;;  %v2559_v47 = vmax.f32 %v2065_v60, 0.0  ;;  %v2068_v18 = vadd.f32 %v4625_v48, %v2067_v5  ;;  %v4121_v2 = vld [vmem:[%s5514_s3 + $0x8] sm:$0xff]   ;;  %v2080_v7 = vpop.f32.mrb[49].mxu1 }
 0x145   :  { %v2741_v13 = vsel %vm941_vm0, %v2432_v35, 0.0  ;;  %v3773_v3 = vpop.f32.mrb[52].mxu0  ;;  %v2562_v46 = vmax.f32 %v2076_v10, 0.0  ;;  %v2745_v35 = vsel %vm941_vm0, %v2434_v21, 0.0  ;;  %3978 = vmatpush3.bf16.msra.mxu1 %v4121_v2 }
 0x146   :  { %v2742_v32 = vadd.f32 %v2741_v13, %v2740_v56  ;;  %v1577_v36 = vadd.f32 %v3773_v3, %v4625_v48  ;;  %v1568_v31 = vpop.f32.mrb[53].mxu0  ;;  %v3012_v44 = vadd.f32 %v3011_v54, %v3010_v45  ;;  %v3015_v6 = vsel %vm941_vm0, %v2559_v47, 0.0  ;;  %v3902_v54 = vpop.f32.mrb[50].mxu1 }
 0x147   :  { %v1569_v37 = vadd.f32 %v4625_v48, %v1568_v31  ;;  %v3774_v23 = vpop.f32.mrb[54].mxu0  ;;  %v3019_v13 = vsel %vm941_vm0, %v2561_v39, 0.0  ;;  %v2083_v21 = vpop.f32.mrb[51].mxu1  ;;  %v3021_v45 = vsel %vm941_vm0, %v2562_v46, 0.0 }
 0x148   :  { %v2744_v34 = vadd.f32 %v2743_v62, %v2742_v32  ;;  %v2437_v40 = vmax.f32 %v1577_v36, 0.0  ;;  %v1580_v0 = vadd.f32 %v3774_v23, %v4625_v48  ;;  %v1571_v59 = vpop.f32.mrb[55].mxu0  ;;  %v3014_v3 = vadd.f32 %v3013_v4, %v3012_v44 }
 0x149   :  { %v2435_v63 = vmax.f32 %v1569_v37, 0.0  ;;  %v1572_v56 = vadd.f32 %v4625_v48, %v1571_v59  ;;  %v2560_v32 = vmax.f32 %v2068_v18, 0.0  ;;  %v2089_v37 = vadd.f32 %v3901_v1, %v4625_v48 }
 0x14a   :  { %v2751_v62 = vsel %vm941_vm0, %v2437_v40, 0.0  ;;  %v2746_v5 = vadd.f32 %v2745_v35, %v2744_v34  ;;  %v2438_v60 = vmax.f32 %v1580_v0, 0.0  ;;  %v3016_v31 = vadd.f32 %v3015_v6, %v3014_v3 }
 0x14b   :  { %v2747_v30 = vsel %vm941_vm0, %v2435_v63, 0.0  ;;  %v2436_v10 = vmax.f32 %v1572_v56, 0.0  ;;  %v3017_v39 = vsel %vm941_vm0, %v2560_v32, 0.0  ;;  %v2081_v4 = vadd.f32 %v4625_v48, %v2080_v7 }
 0x14c   :  { %v2748_v36 = vadd.f32 %v2747_v30, %v2746_v5  ;;  %v2092_v34 = vadd.f32 %v3902_v54, %v4625_v48  ;;  %v3018_v59 = vadd.f32 %v3017_v39, %v3016_v31  ;;  %v2565_v44 = vmax.f32 %v2089_v37, 0.0  ;;  %v3905_v54 = vpop.f32.mrb[52].mxu1 }
 0x14d   :  { %v2749_v23 = vsel %vm941_vm0, %v2436_v10, 0.0  ;;  %v3777_v47 = vpop.f32.mrb[56].mxu0  ;;  %v2753_v2 = vsel %vm941_vm0, %v2438_v60, 0.0  ;;  %v2563_v35 = vmax.f32 %v2081_v4, 0.0  ;;  %v2084_v63 = vadd.f32 %v4625_v48, %v2083_v21  ;;  %v2096_v60 = vpop.f32.mrb[53].mxu1 }
 0x14e   :  { %v2750_v40 = vadd.f32 %v2749_v23, %v2748_v36  ;;  %v1593_v0 = vadd.f32 %v3777_v47, %v4625_v48  ;;  %v1584_v18 = vpop.f32.mrb[57].mxu0  ;;  %v3020_v3 = vadd.f32 %v3019_v13, %v3018_v59  ;;  %v2566_v36 = vmax.f32 %v2092_v34, 0.0  ;;  %v3906_v23 = vpop.f32.mrb[54].mxu1 }
 0x14f   :  { %v1585_v46 = vadd.f32 %v4625_v48, %v1584_v18  ;;  %v3778_v1 = vpop.f32.mrb[58].mxu0  ;;  %v3023_v32 = vsel %vm941_vm0, %v2563_v35, 0.0  ;;  %v2707_v31 = vadd.f32 %v2706_v11, %v4851_v28  ;;  %v2564_v4 = vmax.f32 %v2084_v63, 0.0 }
 0x150   :  { %v2752_v56 = vadd.f32 %v2751_v62, %v2750_v40  ;;  %v2441_v6 = vmax.f32 %v1593_v0, 0.0  ;;  %v1596_v7 = vadd.f32 %v3778_v1, %v4625_v48  ;;  %v1587_v5 = vpop.f32.mrb[59].mxu0  ;;  %v3027_v62 = vsel %vm941_vm0, %v2565_v44, 0.0  ;;  %v2099_v40 = vpop.f32.mrb[55].mxu1 }
 0x151   :  { %v2439_v30 = vmax.f32 %v1585_v46, 0.0  ;;  %v1588_v10 = vadd.f32 %v4625_v48, %v1587_v5  ;;  %v3022_v21 = vadd.f32 %v3021_v45, %v3020_v3  ;;  %v2105_v59 = vadd.f32 %v3905_v54, %v4625_v48 }
 0x152   :  { %v2754_v37 = vadd.f32 %v2753_v2, %v2752_v56  ;;  %v2759_v47 = vsel %vm941_vm0, %v2441_v6, 0.0  ;;  %v2442_v18 = vmax.f32 %v1596_v7, 0.0  ;;  %v3029_v11 = vsel %vm941_vm0, %v2566_v36, 0.0 }
 0x153   :  { %v2755_v13 = vsel %vm941_vm0, %v2439_v30, 0.0  ;;  %v2440_v39 = vmax.f32 %v1588_v10, 0.0  ;;  %v3024_v34 = vadd.f32 %v3023_v32, %v3022_v21  ;;  %v3025_v45 = vsel %vm941_vm0, %v2564_v4, 0.0 }
 0x154   :  { %v2756_v0 = vadd.f32 %v2755_v13, %v2754_v37  ;;  %v2097_v44 = vadd.f32 %v4625_v48, %v2096_v60  ;;  %v2108_v56 = vadd.f32 %v3906_v23, %v4625_v48  ;;  %v2569_v5 = vmax.f32 %v2105_v59, 0.0  ;;  %v3909_v37 = vpop.f32.mrb[56].mxu1  ;;  %v4952_v23 = vld [vmem:[%s5513_s2] ss:$0 sm:$0xff] }
 0x155   :  { %v2757_v46 = vsel %vm941_vm0, %v2440_v39, 0.0  ;;  %v3781_v28 = vpop.f32.mrb[60].mxu0  ;;  %v3026_v63 = vadd.f32 %v3025_v45, %v3024_v34  ;;  %v2100_v54 = vadd.f32 %v4625_v48, %v2099_v40  ;;  %v2761_v21 = vsel %vm941_vm0, %v2442_v18, 0.0  ;;  %v2112_v40 = vpop.f32.mrb[57].mxu1 }
 0x156   :  { %v2758_v2 = vadd.f32 %v2757_v46, %v2756_v0  ;;  %v1609_v1 = vadd.f32 %v3781_v28, %v4625_v48  ;;  %v1600_v35 = vpop.f32.mrb[61].mxu0  ;;  %v2567_v3 = vmax.f32 %v2097_v44, 0.0  ;;  %v2570_v34 = vmax.f32 %v2108_v56, 0.0 }
 0x157   :  { %v1601_v6 = vadd.f32 %v4625_v48, %v1600_v35  ;;  %v3782_v7 = vpop.f32.mrb[62].mxu0  ;;  %v3028_v60 = vadd.f32 %v3027_v62, %v3026_v63  ;;  %v3910_v62 = vpop.f32.mrb[58].mxu1  ;;  %v3035_v46 = vsel %vm941_vm0, %v2569_v5, 0.0  ;;  %v2568_v28 = vmax.f32 %v2100_v54, 0.0 }
 0x158   :  { %v2760_v30 = vadd.f32 %v2759_v47, %v2758_v2  ;;  %v2445_v10 = vmax.f32 %v1609_v1, 0.0  ;;  %v1612_v32 = vadd.f32 %v3782_v7, %v4625_v48  ;;  %v1603_v36 = vpop.f32.mrb[63].mxu0  ;;  %v3031_v4 = vsel %vm941_vm0, %v2567_v3, 0.0  ;;  %v2115_v45 = vpop.f32.mrb[59].mxu1 }
 0x159   :  { %v2443_v13 = vmax.f32 %v1601_v6, 0.0  ;;  %v1604_v39 = vadd.f32 %v4952_v23, %v1603_v36  ;;  %v4956_v47 = vmul.f32 0.00390625, %v2707_v31  ;;  %v3030_v48 = vadd.f32 %v3029_v11, %v3028_v60 }
 0x15a   :  { %v2762_v0 = vadd.f32 %v2761_v21, %v2760_v30  ;;  %v2767_v44 = vsel %vm941_vm0, %v2445_v10, 0.0  ;;  %v2446_v1 = vmax.f32 %v1612_v32, 0.0  ;;  %v3033_v6 = vsel %vm941_vm0, %v2568_v28, 0.0 }
 0x15b   :  { %v2763_v59 = vsel %vm941_vm0, %v2443_v13, 0.0  ;;  %v2444_v18 = vmax.f32 %v1604_v39, 0.0  ;;  %v3032_v35 = vadd.f32 %v3031_v4, %v3030_v48  ;;  %v2121_v11 = vadd.f32 %v4952_v23, %v3909_v37 }
 0x15c   :  { %v2764_v2 = vadd.f32 %v2763_v59, %v2762_v0  ;;  %v2113_v56 = vadd.f32 %v4952_v23, %v2112_v40  ;;  %v3037_v5 = vsel %vm941_vm0, %v2570_v34, 0.0  ;;  %v2124_v30 = vadd.f32 %v4952_v23, %v3910_v62  ;;  %v3913_v0 = vpop.f32.mrb[60].mxu1 }
 0x15d   :  { %v2765_v63 = vsel %vm941_vm0, %v2444_v18, 0.0  ;;  %v3785_v31 = vpop.f32.mrb[64].mxu0  ;;  %v3034_v54 = vadd.f32 %v3033_v6, %v3032_v35  ;;  %v2116_v21 = vadd.f32 %v4952_v23, %v2115_v45  ;;  %v2769_v13 = vsel %vm941_vm0, %v2446_v1, 0.0  ;;  %v2128_v18 = vpop.f32.mrb[61].mxu1 }
 0x15e   :  { %v2766_v7 = vadd.f32 %v2765_v63, %v2764_v2  ;;  %v1616_v3 = vpop.f32.mrb[65].mxu0  ;;  %v1625_v10 = vadd.f32 %v4952_v23, %v3785_v31  ;;  %v2571_v60 = vmax.f32 %v2113_v56, 0.0  ;;  %v2573_v62 = vmax.f32 %v2121_v11, 0.0  ;;  %v3914_v35 = vpop.f32.mrb[62].mxu1 }
 0x15f   :  { %v1617_v32 = vadd.f32 %v4952_v23, %v1616_v3  ;;  %v3786_v36 = vpop.f32.mrb[66].mxu0  ;;  %v3036_v40 = vadd.f32 %v3035_v46, %v3034_v54  ;;  %v2574_v31 = vmax.f32 %v2124_v30, 0.0  ;;  %v2572_v1 = vmax.f32 %v2116_v21, 0.0 }
 0x160   :  { %v2768_v37 = vadd.f32 %v2767_v44, %v2766_v7  ;;  %v1628_v39 = vadd.f32 %v4952_v23, %v3786_v36  ;;  %v1619_v4 = vpop.f32.mrb[67].mxu0  ;;  %v3039_v59 = vsel %vm941_vm0, %v2571_v60, 0.0  ;;  %v2449_v63 = vmax.f32 %v1625_v10, 0.0  ;;  %v2131_v44 = vpop.f32.mrb[63].mxu1 }
 0x161   :  { %v2447_v48 = vmax.f32 %v1617_v32, 0.0  ;;  %v1620_v34 = vadd.f32 %v4952_v23, %v1619_v4  ;;  %v3038_v2 = vadd.f32 %v3037_v5, %v3036_v40  ;;  %v3199_v6 = vpack.c.bf16 %v4956_v47, %v4956_v47 }
 0x162   :  { %v2770_v28 = vadd.f32 %v2769_v13, %v2768_v37  ;;  %v2450_v56 = vmax.f32 %v1628_v39, 0.0  ;;  %v3043_v32 = vsel %vm941_vm0, %v2573_v62, 0.0  ;;  %v3041_v5 = vsel %vm941_vm0, %v2572_v1, 0.0 }
 0x163   :  { %v2448_v45 = vmax.f32 %v1620_v34, 0.0  ;;  %v3040_v7 = vadd.f32 %v3039_v59, %v3038_v2  ;;  %v2777_v3 = vsel %vm941_vm0, %v2447_v48, 0.0  ;;  %v2129_v21 = vadd.f32 %v4952_v23, %v2128_v18 }
 0x164   :  { %v2771_v46 = vrot.slane %v2770_v28, 4  ;;  %v2780_v47 = vsel %vm941_vm0, %v2449_v63, 0.0  ;;  %v3045_v4 = vsel %vm941_vm0, %v2574_v31, 0.0  ;;  %v2782_v48 = vsel %vm941_vm0, %v2450_v56, 0.0 }
 0x165   :  { %v2778_v11 = vsel %vm941_vm0, %v2448_v45, 0.0  ;;  %v3789_v54 = vpop.f32.mrb[68].mxu0  ;;  %v3042_v60 = vadd.f32 %v3041_v5, %v3040_v7  ;;  %v2137_v63 = vadd.f32 %v4952_v23, %v3913_v0  ;;  %v2140_v31 = vadd.f32 %v4952_v23, %v3914_v35 }
 0x166   :  { %v2772_v10 = vadd.f32 %v2771_v46, %v2770_v28  ;;  %v2779_v36 = vadd.f32 %v2778_v11, %v2777_v3  ;;  %v1632_v30 = vpop.f32.mrb[69].mxu0  ;;  %v1641_v13 = vadd.f32 %v4952_v23, %v3789_v54  ;;  %v3917_v28 = vpop.f32.mrb[64].mxu1  ;;  %v2575_v3 = vmax.f32 %v2129_v21, 0.0 }
 0x167   :  { %v1633_v37 = vadd.f32 %v4952_v23, %v1632_v30  ;;  %v3790_v39 = vpop.f32.mrb[70].mxu0  ;;  %v3044_v45 = vadd.f32 %v3043_v32, %v3042_v60  ;;  %v2144_v1 = vpop.f32.mrb[65].mxu1  ;;  %v3226_v60 = vunpack.c.l.b16 %v3199_v6  ;;  %v2132_v35 = vadd.f32 %v4952_v23, %v2131_v44 }
 0x168   :  { %v2773_v40 = vrot.slane %v2772_v10, 2  ;;  %v2781_v34 = vadd.f32 %v2780_v47, %v2779_v36  ;;  %v1644_v62 = vadd.f32 %v4952_v23, %v3790_v39  ;;  %v1635_v59 = vpop.f32.mrb[71].mxu0  ;;  %v4990_v11 = vpop.f32.mrb[66].mxu1  ;;  %v2453_v56 = vmax.f32 %v1641_v13, 0.0 }
 0x169   :  { %v2451_v2 = vmax.f32 %v1633_v37, 0.0  ;;  %v1636_v18 = vadd.f32 %v4952_v23, %v1635_v59  ;;  %v4993_v36 = vadd.f32 %v3045_v4, %v3044_v45  ;;  %v4995_v30 = vpop.f32.mrb[67].mxu1  ;;  %v2577_v37 = vmax.f32 %v2137_v63, 0.0 }
 0x16a   :  { %v2774_v46 = vadd.f32 %v2773_v40, %v2772_v10  ;;  %v2783_v7 = vadd.f32 %v2782_v48, %v2781_v34  ;;  %v2454_v0 = vmax.f32 %v1644_v62, 0.0  ;;  %v2578_v4 = vmax.f32 %v2140_v31, 0.0 }
 0x16b   :  { %v2784_v54 = vsel %vm941_vm0, %v2451_v2, 0.0  ;;  %v2452_v5 = vmax.f32 %v1636_v18, 0.0  ;;  %5524 = vst [vmem:[#allocation9_spill] sm:$0xff] %v4993_v36  ;;  %v2788_v34 = vsel %vm941_vm0, %v2453_v56, 0.0  ;;  %v3053_v62 = vsel %vm941_vm0, %v2575_v3, 0.0 }
 0x16c   :  { %v2775_v47 = vrot.slane %v2774_v46, 1  ;;  %v2785_v32 = vadd.f32 %v2784_v54, %v2783_v7  ;;  %v2576_v6 = vmax.f32 %v2132_v35, 0.0  ;;  %v2790_v45 = vsel %vm941_vm0, %v2454_v0, 0.0  ;;  %v3921_v7 = vpop.f32.mrb[68].mxu1 }
 0x16d   :  { %v2786_v10 = vsel %vm941_vm0, %v2452_v5, 0.0  ;;  %v3793_v21 = vpop.f32.mrb[72].mxu0  ;;  %v2145_v56 = vadd.f32 %v4952_v23, %v2144_v1  ;;  %v2153_v1 = vadd.f32 %v4952_v23, %v3917_v28 }
 0x16e   :  { %v2776_v39 = vadd.f32 %v2775_v47, %v2774_v46  ;;  %v2787_v13 = vadd.f32 %v2786_v10, %v2785_v32  ;;  %v1657_v40 = vadd.f32 %v4952_v23, %v3793_v21  ;;  %v1648_v48 = vpop.f32.mrb[73].mxu0  ;;  %v3054_v31 = vsel %vm941_vm0, %v2576_v6, 0.0  ;;  %v2160_v47 = vpop.f32.mrb[69].mxu1 }
 0x16f   :  { %v1649_v59 = vadd.f32 %v4952_v23, %v1648_v48  ;;  %v3794_v2 = vpop.f32.mrb[74].mxu0  ;;  %v3056_v21 = vsel %vm941_vm0, %v2577_v37, 0.0  ;;  %v5009_v35 = vpop.f32.mrb[70].mxu1  ;;  %v3055_v48 = vadd.f32 %v3054_v31, %v3053_v62  ;;  %v3058_v6 = vsel %vm941_vm0, %v2578_v4, 0.0 }
 0x170   :  { %v3192_v18 = vmul.f32 0.00390625, %v2776_v39  ;;  %v2789_v63 = vadd.f32 %v2788_v34, %v2787_v13  ;;  %v1660_v44 = vadd.f32 %v4952_v23, %v3794_v2  ;;  %v1651_v46 = vpop.f32.mrb[75].mxu0  ;;  %v2457_v10 = vmax.f32 %v1657_v40, 0.0  ;;  %v2163_v34 = vpop.f32.mrb[71].mxu1 }
 0x171   :  { %v2455_v54 = vmax.f32 %v1649_v59, 0.0  ;;  %v1652_v5 = vadd.f32 %v4952_v23, %v1651_v46 }
 0x172   :  { %v3200_v32 = vpack.c.bf16 %v3192_v18, %v3192_v18  ;;  %v2791_v3 = vadd.f32 %v2790_v45, %v2789_v63  ;;  %v2458_v39 = vmax.f32 %v1660_v44, 0.0  ;;  %v3057_v45 = vadd.f32 %v3056_v21, %v3055_v48 }
 0x173   :  { %v2792_v0 = vsel %vm941_vm0, %v2455_v54, 0.0  ;;  %v2456_v13 = vmax.f32 %v1652_v5, 0.0  ;;  %v2579_v63 = vmax.f32 %v2145_v56, 0.0  ;;  %v2796_v46 = vsel %vm941_vm0, %v2457_v10, 0.0 }
 0x174   :  { %v3227_v59 = vunpack.c.l.b16 %v3200_v32  ;;  %v2793_v2 = vadd.f32 %v2792_v0, %v2791_v3  ;;  %v2798_v5 = vsel %vm941_vm0, %v2458_v39, 0.0  ;;  %v3059_v28 = vadd.f32 %v3058_v6, %v3057_v45 }
 0x175   :  { %v2794_v18 = vsel %vm941_vm0, %v2456_v13, 0.0  ;;  %v3797_v40 = vpop.f32.mrb[76].mxu0  ;;  %v3060_v32 = vsel %vm941_vm0, %v2579_v63, 0.0  ;;  %v2581_v0 = vmax.f32 %v2153_v1, 0.0  ;;  %v3925_v13 = vpop.f32.mrb[72].mxu1  ;;  %v2156_v39 = vadd.f32 %v4952_v23, %v4990_v11 }
 0x176   :  { %v5016_v37 = vsel %vm3234_vm1, %v3227_v59, %v3226_v60  ;;  %v2795_v44 = vadd.f32 %v2794_v18, %v2793_v2  ;;  %v1673_v62 = vadd.f32 %v4952_v23, %v3797_v40  ;;  %v1664_v54 = vpop.f32.mrb[77].mxu0  ;;  %v3061_v59 = vadd.f32 %v3060_v32, %v3059_v28  ;;  %v2176_v2 = vpop.f32.mrb[73].mxu1 }
 0x177   :  { %v1665_v4 = vadd.f32 %v4952_v23, %v1664_v54  ;;  %v3798_v31 = vpop.f32.mrb[78].mxu0  ;;  %v5027_v6 = vpop.f32.mrb[74].mxu1  ;;  %v3064_v54 = vsel %vm941_vm0, %v2581_v0, 0.0  ;;  %v2161_v32 = vadd.f32 %v4952_v23, %v2160_v47 }
 0x178   :  { %v2797_v3 = vadd.f32 %v2796_v46, %v2795_v44  ;;  %v2461_v21 = vmax.f32 %v1673_v62, 0.0  ;;  %v1676_v56 = vadd.f32 %v4952_v23, %v3798_v31  ;;  %v1667_v60 = vpop.f32.mrb[79].mxu0  ;;  %v2148_v46 = vadd.f32 %v4952_v23, %v4995_v30  ;;  %v2179_v1 = vpop.f32.mrb[75].mxu1 }
 0x179   :  { %v2459_v10 = vmax.f32 %v1665_v4, 0.0  ;;  %v1668_v48 = vadd.f32 %v4952_v23, %v1667_v60  ;;  %v2169_v4 = vadd.f32 %v4952_v23, %v3921_v7  ;;  %v2582_v31 = vmax.f32 %v2156_v39, 0.0 }
 0x17a   :  { %v2799_v18 = vadd.f32 %v2798_v5, %v2797_v3  ;;  %v2462_v40 = vmax.f32 %v1676_v56, 0.0  ;;  %v2804_v44 = vsel %vm941_vm0, %v2461_v21, 0.0  ;;  %v2580_v28 = vmax.f32 %v2148_v46, 0.0 }
 0x17b   :  { %v2800_v45 = vsel %vm941_vm0, %v2459_v10, 0.0  ;;  %v2460_v63 = vmax.f32 %v1668_v48, 0.0  ;;  %v2585_v10 = vmax.f32 %v2169_v4, 0.0  ;;  %v2583_v7 = vmax.f32 %v2161_v32, 0.0 }
 0x17c   :  { %v2801_v62 = vadd.f32 %v2800_v45, %v2799_v18  ;;  %v2806_v3 = vsel %vm941_vm0, %v2462_v40, 0.0  ;;  %v3062_v0 = vsel %vm941_vm0, %v2580_v28, 0.0  ;;  %v2164_v18 = vadd.f32 %v4952_v23, %v2163_v34  ;;  %v3929_v40 = vpop.f32.mrb[76].mxu1 }
 0x17d   :  { %v2802_v11 = vsel %vm941_vm0, %v2460_v63, 0.0  ;;  %v3801_v5 = vpop.f32.mrb[80].mxu0  ;;  %v3063_v46 = vadd.f32 %v3062_v0, %v3061_v59  ;;  %v3066_v4 = vsel %vm941_vm0, %v2582_v31, 0.0  ;;  %v3072_v34 = vsel %vm941_vm0, %v2585_v10, 0.0 }
 0x17e   :  { %v2803_v56 = vadd.f32 %v2802_v11, %v2801_v62  ;;  %v1689_v30 = vadd.f32 %v4952_v23, %v3801_v5  ;;  %v1680_v60 = vpop.f32.mrb[81].mxu0  ;;  %v2172_v5 = vadd.f32 %v4952_v23, %v5009_v35  ;;  %v2185_v35 = vadd.f32 %v4952_v23, %v3925_v13 }
 0x17f   :  { %v1681_v21 = vadd.f32 %v4952_v23, %v1680_v60  ;;  %v3802_v48 = vpop.f32.mrb[82].mxu0  ;;  %v2192_v60 = vpop.f32.mrb[77].mxu1  ;;  %v3065_v32 = vadd.f32 %v3064_v54, %v3063_v46 }
 0x180   :  { %v2805_v45 = vadd.f32 %v2804_v44, %v2803_v56  ;;  %v2465_v39 = vmax.f32 %v1689_v30, 0.0  ;;  %v1692_v63 = vadd.f32 %v4952_v23, %v3802_v48  ;;  %v1683_v47 = vpop.f32.mrb[83].mxu0  ;;  %v3068_v44 = vsel %vm941_vm0, %v2583_v7, 0.0  ;;  %v5049_v56 = vpop.f32.mrb[78].mxu1 }
 0x181   :  { %v2463_v62 = vmax.f32 %v1681_v21, 0.0  ;;  %v1684_v11 = vadd.f32 %v4952_v23, %v1683_v47  ;;  %v2584_v48 = vmax.f32 %v2164_v18, 0.0  ;;  %v2195_v0 = vpop.f32.mrb[79].mxu1  ;;  %v3067_v38 = vadd.f32 %v3066_v4, %v3065_v32 }
 0x182   :  { %v2807_v28 = vadd.f32 %v2806_v3, %v2805_v45  ;;  %v2466_v30 = vmax.f32 %v1692_v63, 0.0  ;;  %v2812_v31 = vsel %vm941_vm0, %v2465_v39, 0.0  ;;  %v2586_v10 = vmax.f32 %v2172_v5, 0.0 }
 0x183   :  { %v2808_v59 = vsel %vm941_vm0, %v2463_v62, 0.0  ;;  %v2464_v21 = vmax.f32 %v1684_v11, 0.0  ;;  %v3070_v7 = vsel %vm941_vm0, %v2584_v48, 0.0  ;;  %v2177_v45 = vadd.f32 %v4952_v23, %v2176_v2 }
 0x184   :  { %v2809_v47 = vadd.f32 %v2808_v59, %v2807_v28  ;;  %v3069_v18 = vadd.f32 %v3068_v44, %v3067_v38  ;;  %v2589_v11 = vmax.f32 %v2185_v35, 0.0  ;;  %v2814_v39 = vsel %vm941_vm0, %v2466_v30, 0.0 }
 0x185   :  { %v2810_v54 = vsel %vm941_vm0, %v2464_v21, 0.0  ;;  %v3805_v3 = vpop.f32.mrb[84].mxu0  ;;  %v2587_v13 = vmax.f32 %v2177_v45, 0.0  ;;  %v2180_v32 = vadd.f32 %v4952_v23, %v2179_v1  ;;  %v3074_v38 = vsel %vm941_vm0, %v2586_v10, 0.0 }
 0x186   :  { %v2811_v46 = vadd.f32 %v2810_v54, %v2809_v47  ;;  %v1705_v63 = vadd.f32 %v4952_v23, %v3805_v3  ;;  %v1696_v62 = vpop.f32.mrb[85].mxu0  ;;  %v3071_v2 = vadd.f32 %v3070_v7, %v3069_v18  ;;  %v3933_v47 = vpop.f32.mrb[80].mxu1  ;;  %v2188_v44 = vadd.f32 %v4952_v23, %v5027_v6 }
 0x187   :  { %v1697_v4 = vadd.f32 %v4952_v23, %v1696_v62  ;;  %v3806_v28 = vpop.f32.mrb[86].mxu0  ;;  %v2208_v30 = vpop.f32.mrb[81].mxu1  ;;  %v3080_v1 = vsel %vm941_vm0, %v2589_v11, 0.0  ;;  %v2588_v18 = vmax.f32 %v2180_v32, 0.0  ;;  %v2201_v6 = vadd.f32 %v4952_v23, %v3929_v40 }
 0x188   :  { %v2813_v59 = vadd.f32 %v2812_v31, %v2811_v46  ;;  %v2469_v5 = vmax.f32 %v1705_v63, 0.0  ;;  %v1708_v21 = vadd.f32 %v4952_v23, %v3806_v28  ;;  %v1699_v48 = vpop.f32.mrb[87].mxu0  ;;  %v3073_v45 = vadd.f32 %v3072_v34, %v3071_v2  ;;  %v5068_v46 = vpop.f32.mrb[82].mxu1 }
 0x189   :  { %v2467_v54 = vmax.f32 %v1697_v4, 0.0  ;;  %v1700_v3 = vadd.f32 %v4952_v23, %v1699_v48  ;;  %v3076_v31 = vsel %vm941_vm0, %v2587_v13, 0.0  ;;  %v2211_v4 = vpop.f32.mrb[83].mxu1  ;;  %v2590_v11 = vmax.f32 %v2188_v44, 0.0 }
 0x18a   :  { %v2815_v35 = vadd.f32 %v2814_v39, %v2813_v59  ;;  %v2470_v63 = vmax.f32 %v1708_v21, 0.0  ;;  %v2820_v10 = vsel %vm941_vm0, %v2469_v5, 0.0  ;;  %v3075_v48 = vadd.f32 %v3074_v38, %v3073_v45 }
 0x18b   :  { %v2816_v7 = vsel %vm941_vm0, %v2467_v54, 0.0  ;;  %v2468_v62 = vmax.f32 %v1700_v3, 0.0  ;;  %v3078_v13 = vsel %vm941_vm0, %v2588_v18, 0.0  ;;  %v2193_v59 = vadd.f32 %v4952_v23, %v2192_v60 }
 0x18c   :  { %v2817_v28 = vadd.f32 %v2816_v7, %v2815_v35  ;;  %v3077_v32 = vadd.f32 %v3076_v31, %v3075_v48  ;;  %v2593_v3 = vmax.f32 %v2201_v6, 0.0  ;;  %v2822_v5 = vsel %vm941_vm0, %v2470_v63, 0.0 }
 0x18d   :  { %v2818_v34 = vsel %vm941_vm0, %v2468_v62, 0.0  ;;  %v3809_v39 = vpop.f32.mrb[88].mxu0  ;;  %v2591_v40 = vmax.f32 %v2193_v59, 0.0  ;;  %v2196_v45 = vadd.f32 %v4952_v23, %v2195_v0  ;;  %v3082_v31 = vsel %vm941_vm0, %v2590_v11, 0.0 }
 0x18e   :  { %v2819_v2 = vadd.f32 %v2818_v34, %v2817_v28  ;;  %v1721_v21 = vadd.f32 %v4952_v23, %v3809_v39  ;;  %v1712_v54 = vpop.f32.mrb[89].mxu0  ;;  %v3079_v60 = vadd.f32 %v3078_v13, %v3077_v32  ;;  %v3937_v28 = vpop.f32.mrb[84].mxu1  ;;  %v2204_v63 = vadd.f32 %v4952_v23, %v5049_v56 }
 0x18f   :  { %v1713_v38 = vadd.f32 %v4952_v23, %v1712_v54  ;;  %v3810_v35 = vpop.f32.mrb[90].mxu0  ;;  %v2224_v48 = vpop.f32.mrb[85].mxu1  ;;  %v3088_v0 = vsel %vm941_vm0, %v2593_v3, 0.0  ;;  %v2592_v32 = vmax.f32 %v2196_v45, 0.0  ;;  %v2217_v56 = vadd.f32 %v4952_v23, %v3933_v47 }
 0x190   :  { %v2821_v7 = vadd.f32 %v2820_v10, %v2819_v2  ;;  %v2473_v44 = vmax.f32 %v1721_v21, 0.0  ;;  %v1724_v62 = vadd.f32 %v4952_v23, %v3810_v35  ;;  %v1715_v18 = vpop.f32.mrb[91].mxu0  ;;  %v3081_v59 = vadd.f32 %v3080_v1, %v3079_v60  ;;  %v5087_v2 = vpop.f32.mrb[86].mxu1 }
 0x191   :  { %v2471_v34 = vmax.f32 %v1713_v38, 0.0  ;;  %v1716_v39 = vadd.f32 %v4952_v23, %v1715_v18  ;;  %v3084_v10 = vsel %vm941_vm0, %v2591_v40, 0.0  ;;  %v2227_v38 = vpop.f32.mrb[87].mxu1  ;;  %v2594_v3 = vmax.f32 %v2204_v63, 0.0 }
 0x192   :  { %v2823_v6 = vadd.f32 %v2822_v5, %v2821_v7  ;;  %v2474_v21 = vmax.f32 %v1724_v62, 0.0  ;;  %v2828_v11 = vsel %vm941_vm0, %v2473_v44, 0.0  ;;  %v3083_v18 = vadd.f32 %v3082_v31, %v3081_v59 }
 0x193   :  { %v2824_v13 = vsel %vm941_vm0, %v2471_v34, 0.0  ;;  %v2472_v54 = vmax.f32 %v1716_v39, 0.0  ;;  %v3086_v40 = vsel %vm941_vm0, %v2592_v32, 0.0  ;;  %v2209_v7 = vadd.f32 %v4952_v23, %v2208_v30 }
 0x194   :  { %v2825_v35 = vadd.f32 %v2824_v13, %v2823_v6  ;;  %v3085_v45 = vadd.f32 %v3084_v10, %v3083_v18  ;;  %v2597_v39 = vmax.f32 %v2217_v56, 0.0  ;;  %v2830_v44 = vsel %vm941_vm0, %v2474_v21, 0.0 }
 0x195   :  { %v2826_v1 = vsel %vm941_vm0, %v2472_v54, 0.0  ;;  %v3813_v5 = vpop.f32.mrb[92].mxu0  ;;  %v2595_v47 = vmax.f32 %v2209_v7, 0.0  ;;  %v2212_v59 = vadd.f32 %v4952_v23, %v2211_v4  ;;  %v3090_v10 = vsel %vm941_vm0, %v2594_v3, 0.0 }
 0x196   :  { %v2827_v60 = vadd.f32 %v2826_v1, %v2825_v35  ;;  %v1737_v62 = vadd.f32 %v4952_v23, %v3813_v5  ;;  %v1728_v34 = vpop.f32.mrb[93].mxu0  ;;  %v3087_v30 = vadd.f32 %v3086_v40, %v3085_v45  ;;  %v3941_v35 = vpop.f32.mrb[88].mxu1  ;;  %v2220_v21 = vadd.f32 %v4952_v23, %v5068_v46 }
 0x197   :  { %v1729_v31 = vadd.f32 %v4952_v23, %v1728_v34  ;;  %v3814_v6 = vpop.f32.mrb[94].mxu0  ;;  %v2240_v18 = vpop.f32.mrb[89].mxu1  ;;  %v3096_v4 = vsel %vm941_vm0, %v2597_v39, 0.0  ;;  %v2596_v45 = vmax.f32 %v2212_v59, 0.0 }
 0x198   :  { %v2829_v13 = vadd.f32 %v2828_v11, %v2827_v60  ;;  %v2477_v63 = vmax.f32 %v1737_v62, 0.0  ;;  %v1740_v54 = vadd.f32 %v4952_v23, %v3814_v6  ;;  %v1731_v32 = vpop.f32.mrb[95].mxu0  ;;  %v3089_v7 = vadd.f32 %v3088_v0, %v3087_v30  ;;  %v5106_v60 = vpop.f32.mrb[90].mxu1 }
 0x199   :  { %v2475_v1 = vmax.f32 %v1729_v31, 0.0  ;;  %v1732_v5 = vadd.f32 %v4952_v23, %v1731_v32  ;;  %v3092_v11 = vsel %vm941_vm0, %v2595_v47, 0.0  ;;  %v5109_v31 = vpop.f32.mrb[91].mxu1  ;;  %v3094_v47 = vsel %vm941_vm0, %v2596_v45, 0.0 }
 0x19a   :  { %v2831_v56 = vadd.f32 %v2830_v44, %v2829_v13  ;;  %v2478_v62 = vmax.f32 %v1740_v54, 0.0  ;;  %v2836_v3 = vsel %vm941_vm0, %v2477_v63, 0.0  ;;  %v3091_v46 = vadd.f32 %v3090_v10, %v3089_v7 }
 0x19b   :  { %v2832_v40 = vsel %vm941_vm0, %v2475_v1, 0.0  ;;  %v2476_v34 = vmax.f32 %v1732_v5, 0.0  ;;  %v2233_v44 = vadd.f32 %v4952_v23, %v3937_v28  ;;  %v2598_v13 = vmax.f32 %v2220_v21, 0.0 }
 0x19c   :  { %v2833_v6 = vadd.f32 %v2832_v40, %v2831_v56  ;;  %v2225_v32 = vadd.f32 %v4952_v23, %v2224_v48  ;;  %v3093_v1 = vadd.f32 %v3092_v11, %v3091_v46  ;;  %v2838_v63 = vsel %vm941_vm0, %v2478_v62, 0.0 }
 0x19d   :  { %v2834_v0 = vsel %vm941_vm0, %v2476_v34, 0.0  ;;  %v3817_v39 = vpop.f32.mrb[96].mxu0  ;;  %v2601_v5 = vmax.f32 %v2233_v44, 0.0  ;;  %v2228_v7 = vadd.f32 %v4952_v23, %v2227_v38  ;;  %v3098_v46 = vsel %vm941_vm0, %v2598_v13, 0.0 }
 0x19e   :  { %v2835_v30 = vadd.f32 %v2834_v0, %v2833_v6  ;;  %v1753_v54 = vadd.f32 %v4952_v23, %v3817_v39  ;;  %v1744_v59 = vpop.f32.mrb[97].mxu0  ;;  %v2599_v28 = vmax.f32 %v2225_v32, 0.0  ;;  %v3095_v48 = vadd.f32 %v3094_v47, %v3093_v1  ;;  %v5121_v6 = vpop.f32.mrb[92].mxu1 }
 0x19f   :  { %v1745_v10 = vadd.f32 %v4952_v23, %v1744_v59  ;;  %v3818_v56 = vpop.f32.mrb[98].mxu0  ;;  %v2236_v62 = vadd.f32 %v4952_v23, %v5087_v2  ;;  %v5127_v44 = vpop.f32.mrb[93].mxu1  ;;  %v2600_v1 = vmax.f32 %v2228_v7, 0.0 }
 0x1a0   :  { %v2837_v40 = vadd.f32 %v2836_v3, %v2835_v30  ;;  %v2481_v21 = vmax.f32 %v1753_v54, 0.0  ;;  %v1756_v34 = vadd.f32 %v4952_v23, %v3818_v56  ;;  %v1747_v45 = vpop.f32.mrb[99].mxu0  ;;  %v3097_v38 = vadd.f32 %v3096_v4, %v3095_v48  ;;  %v5131_v30 = vpop.f32.mrb[94].mxu1 }
 0x1a1   :  { %v2479_v0 = vmax.f32 %v1745_v10, 0.0  ;;  %v1748_v11 = vadd.f32 %v4952_v23, %v1747_v45  ;;  %v3104_v3 = vsel %vm941_vm0, %v2601_v5, 0.0  ;;  %v3100_v32 = vsel %vm941_vm0, %v2599_v28, 0.0  ;;  %v5134_v10 = vpop.f32.mrb[95].mxu1 }
 0x1a2   :  { %v2839_v39 = vadd.f32 %v2838_v63, %v2837_v40  ;;  %v2849_v47 = vsel %vm941_vm0, %v2481_v21, 0.0  ;;  %v2482_v54 = vmax.f32 %v1756_v34, 0.0  ;;  %v3099_v56 = vadd.f32 %v3098_v46, %v3097_v38 }
 0x1a3   :  { %v2480_v59 = vmax.f32 %v1748_v11, 0.0  ;;  %v2846_v2 = vsel %vm941_vm0, %v2479_v0, 0.0  ;;  %v2249_v63 = vadd.f32 %v4952_v23, %v3941_v35  ;;  %v2602_v40 = vmax.f32 %v2236_v62, 0.0 }
 0x1a4   :  { %v2840_v13 = vrot.slane %v2839_v39, 4  ;;  %v3102_v28 = vsel %vm941_vm0, %v2600_v1, 0.0  ;;  %v2241_v45 = vadd.f32 %v4952_v23, %v2240_v18  ;;  %v3101_v11 = vadd.f32 %v3100_v32, %v3099_v56  ;;  %v5145_v18 = vpop.f32.mrb[96].mxu1 }
 0x1a5   :  { %v2847_v4 = vsel %vm941_vm0, %v2480_v59, 0.0  ;;  %v3821_v5 = vpop.f32.mrb[100].mxu0  ;;  %v2851_v29 = vsel %vm941_vm0, %v2482_v54, 0.0  ;;  %v2605_v35 = vmax.f32 %v2249_v63, 0.0  ;;  %v2252_v32 = vadd.f32 %v4952_v23, %v5106_v60  ;;  %v5150_v54 = vpop.f32.mrb[97].mxu1 }
 0x1a6   :  { %v2841_v21 = vadd.f32 %v2840_v13, %v2839_v39  ;;  %v2848_v34 = vadd.f32 %v2847_v4, %v2846_v2  ;;  %v1769_v7 = vadd.f32 %v4952_v23, %v3821_v5  ;;  %v1760_v48 = vpop.f32.mrb[101].mxu0  ;;  %v2603_v38 = vmax.f32 %v2241_v45, 0.0  ;;  %v5154_v5 = vpop.f32.mrb[98].mxu1 }
 0x1a7   :  { %v1761_v0 = vadd.f32 %v4952_v23, %v1760_v48  ;;  %v3822_v46 = vpop.f32.mrb[102].mxu0  ;;  %v3103_v2 = vadd.f32 %v3102_v28, %v3101_v11  ;;  %v3106_v4 = vsel %vm941_vm0, %v2602_v40, 0.0  ;;  %v5157_v28 = vpop.f32.mrb[99].mxu1 }
 0x1a8   :  { %v2842_v59 = vrot.slane %v2841_v21, 2  ;;  %v2850_v12 = vadd.f32 %v2849_v47, %v2848_v34  ;;  %v2485_v62 = vmax.f32 %v1769_v7, 0.0  ;;  %v1772_v1 = vadd.f32 %v4952_v23, %v3822_v46  ;;  %v1763_v36 = vpop.f32.mrb[103].mxu0 }
 0x1a9   :  { %v2483_v39 = vmax.f32 %v1761_v0, 0.0  ;;  %v1764_v13 = vadd.f32 %v4952_v23, %v1763_v36  ;;  %v3112_v47 = vsel %vm941_vm0, %v2605_v35, 0.0  ;;  %v3105_v36 = vadd.f32 %v3104_v3, %v3103_v2 }
 0x1aa   :  { %v2843_v56 = vadd.f32 %v2842_v59, %v2841_v21  ;;  %v2852_v63 = vadd.f32 %v2851_v29, %v2850_v12  ;;  %v2486_v34 = vmax.f32 %v1772_v1, 0.0  ;;  %v2857_v60 = vsel %vm941_vm0, %v2485_v62, 0.0 }
 0x1ab   :  { %v2853_v45 = vsel %vm941_vm0, %v2483_v39, 0.0  ;;  %v2484_v7 = vmax.f32 %v1764_v13, 0.0  ;;  %v3108_v12 = vsel %vm941_vm0, %v2603_v38, 0.0  ;;  %v3107_v21 = vadd.f32 %v3106_v4, %v3105_v36 }
 0x1ac   :  { %v2844_v48 = vrot.slane %v2843_v56, 1  ;;  %v2854_v11 = vadd.f32 %v2853_v45, %v2852_v63  ;;  %v2606_v0 = vmax.f32 %v2252_v32, 0.0  ;;  %v2244_v46 = vadd.f32 %v4952_v23, %v5109_v31 }
 0x1ad   :  { %v2855_v29 = vsel %vm941_vm0, %v2484_v7, 0.0  ;;  %v3825_v40 = vpop.f32.mrb[104].mxu0  ;;  %v2265_v39 = vadd.f32 %v4952_v23, %v5121_v6  ;;  %v2859_v62 = vsel %vm941_vm0, %v2486_v34, 0.0  ;;  %v3109_v2 = vadd.f32 %v3108_v12, %v3107_v21  ;;  %v5170_v7 = vpop.f32.mrb[100].mxu1 }
 0x1ae   :  { %v2845_v35 = vadd.f32 %v2844_v48, %v2843_v56  ;;  %v2856_v59 = vadd.f32 %v2855_v29, %v2854_v11  ;;  %v1785_v3 = vadd.f32 %v4952_v23, %v3825_v40  ;;  %v1776_v1 = vpop.f32.mrb[105].mxu0  ;;  %v2604_v63 = vmax.f32 %v2244_v46, 0.0  ;;  %v5175_v11 = vpop.f32.mrb[101].mxu1 }
 0x1af   :  { %v1777_v38 = vadd.f32 %v4952_v23, %v1776_v1  ;;  %v3826_v13 = vpop.f32.mrb[106].mxu0  ;;  %v3114_v6 = vsel %vm941_vm0, %v2606_v0, 0.0  ;;  %v5178_v21 = vpop.f32.mrb[102].mxu1 }
 0x1b0   :  { %v3193_v4 = vmul.f32 0.00390625, %v2845_v35  ;;  %v2858_v32 = vadd.f32 %v2857_v60, %v2856_v59  ;;  %v2489_v45 = vmax.f32 %v1785_v3, 0.0  ;;  %v1788_v31 = vadd.f32 %v4952_v23, %v3826_v13  ;;  %v1779_v56 = vpop.f32.mrb[107].mxu0  ;;  %v5183_v1 = vpop.f32.mrb[103].mxu1 }
 0x1b1   :  { %v2487_v36 = vmax.f32 %v1777_v38, 0.0  ;;  %v1780_v48 = vadd.f32 %v4952_v23, %v1779_v56  ;;  %v3110_v34 = vsel %vm941_vm0, %v2604_v63, 0.0  ;;  %v2609_v60 = vmax.f32 %v2265_v39, 0.0 }
 0x1b2   :  { %v3201_v29 = vpack.c.bf16 %v3193_v4, %v3193_v4  ;;  %v2865_v12 = vsel %vm941_vm0, %v2489_v45, 0.0  ;;  %v2860_v40 = vadd.f32 %v2859_v62, %v2858_v32  ;;  %v3111_v59 = vadd.f32 %v3110_v34, %v3109_v2 }
 0x1b3   :  { %v2861_v46 = vsel %vm941_vm0, %v2487_v36, 0.0  ;;  %v2488_v35 = vmax.f32 %v1780_v48, 0.0  ;;  %v2257_v3 = vadd.f32 %v4952_v23, %v5127_v44  ;;  %v2490_v13 = vmax.f32 %v1788_v31, 0.0 }
 0x1b4   :  { %v3228_v0 = vunpack.c.l.b16 %v3201_v29  ;;  %v2862_v38 = vadd.f32 %v2861_v46, %v2860_v40  ;;  %v2268_v63 = vadd.f32 %v4952_v23, %v5131_v30  ;;  %v3113_v4 = vadd.f32 %v3112_v47, %v3111_v59  ;;  %v5203_v59 = vpop.f32.mrb[104].mxu1 }
 0x1b5   :  { %v2863_v62 = vsel %vm941_vm0, %v2488_v35, 0.0  ;;  %v3829_v39 = vpop.f32.mrb[108].mxu0  ;;  %v2607_v32 = vmax.f32 %v2257_v3, 0.0  ;;  %v2260_v45 = vadd.f32 %v4952_v23, %v5134_v10  ;;  %v1897_v10 = vadd.f32 %v4952_v23, %v4660_v14 }
 0x1b6   :  { %v5192_v2 = vsel %vm3236_vm2, %v3228_v0, %v5016_v37  ;;  %v2864_v44 = vadd.f32 %v2863_v62, %v2862_v38  ;;  %v1801_v56 = vadd.f32 %v4952_v23, %v3829_v39  ;;  %v1792_v36 = vpop.f32.mrb[109].mxu0  ;;  %v2610_v31 = vmax.f32 %v2268_v63, 0.0  ;;  %v5208_v63 = vpop.f32.mrb[105].mxu1 }
 0x1b7   :  { %v1793_v48 = vadd.f32 %v4952_v23, %v1792_v36  ;;  %v3830_v30 = vpop.f32.mrb[110].mxu0  ;;  %v5196_v34 = vadd.f32 %v3114_v6, %v3113_v4  ;;  %v3122_v47 = vsel %vm941_vm0, %v2607_v32, 0.0  ;;  %v2608_v29 = vmax.f32 %v2260_v45, 0.0  ;;  %v5212_v4 = vpop.f32.mrb[106].mxu1 }
 0x1b8   :  { %v2866_v40 = vadd.f32 %v2865_v12, %v2864_v44  ;;  %v1804_v37 = vadd.f32 %v4952_v23, %v3830_v30  ;;  %v1795_v46 = vpop.f32.mrb[111].mxu0  ;;  %v3125_v35 = vsel %vm941_vm0, %v2609_v60, 0.0  ;;  %v2867_v3 = vsel %vm941_vm0, %v2490_v13, 0.0  ;;  %v5216_v45 = vpop.f32.mrb[107].mxu1 }
 0x1b9   :  { %5525 = vst [vmem:[#allocation10_spill] sm:$0xff] %v5196_v34  ;;  %v2491_v0 = vmax.f32 %v1793_v48, 0.0  ;;  %v1796_v6 = vadd.f32 %v4952_v23, %v1795_v46  ;;  %v3123_v38 = vsel %vm941_vm0, %v2608_v29, 0.0  ;;  %v1889_v14 = vadd.f32 %v4952_v23, %v4668_v20 }
 0x1ba   :  { %v2493_v12 = vmax.f32 %v1801_v56, 0.0  ;;  %v2868_v62 = vadd.f32 %v2867_v3, %v2866_v40  ;;  %v3124_v39 = vadd.f32 %v3123_v38, %v3122_v47  ;;  %v3127_v13 = vsel %vm941_vm0, %v2610_v31, 0.0 }
 0x1bb   :  { %v2869_v60 = vsel %vm941_vm0, %v2491_v0, 0.0  ;;  %v2492_v32 = vmax.f32 %v1796_v6, 0.0  ;;  %v2494_v36 = vmax.f32 %v1804_v37, 0.0  ;;  %v2517_v30 = vmax.f32 %v1897_v10, 0.0 }
 0x1bc   :  { %v2870_v44 = vadd.f32 %v2869_v60, %v2868_v62  ;;  %v3126_v48 = vadd.f32 %v3125_v35, %v3124_v39  ;;  %v5220_v29 = vadd.f32 %v4952_v23, %v4671_v22  ;;  %v2273_v47 = vadd.f32 %v4952_v23, %v5150_v54  ;;  %v5237_v39 = vpop.f32.mrb[108].mxu1 }
 0x1bd   :  { %v2871_v20 = vsel %vm941_vm0, %v2492_v32, 0.0  ;;  %v3833_v56 = vpop.f32.mrb[112].mxu0  ;;  %v2515_v40 = vmax.f32 %v1889_v14, 0.0  ;;  %v2873_v46 = vsel %vm941_vm0, %v2493_v12, 0.0  ;;  %v2281_v22 = vadd.f32 %v4952_v23, %v5145_v18  ;;  %v5242_v32 = vld [vmem:[%s5513_s2] ss:$0 sm:$0xff] }
 0x1be   :  { %v2872_v31 = vadd.f32 %v2871_v20, %v2870_v44  ;;  %v1808_v3 = vpop.f32.mrb[113].mxu0  ;;  %v3128_v0 = vadd.f32 %v3127_v13, %v3126_v48  ;;  %v1817_v37 = vadd.f32 %v4952_v23, %v3833_v56  ;;  %v2611_v6 = vmax.f32 %v2273_v47, 0.0  ;;  %v5247_v44 = vpop.f32.mrb[109].mxu1 }
 0x1bf   :  { %v1809_v10 = vadd.f32 %v4952_v23, %v1808_v3  ;;  %v3834_v35 = vpop.f32.mrb[114].mxu0  ;;  %v5232_v38 = vadd.f32 %v4952_v23, %v4678_v27  ;;  %v2875_v54 = vsel %vm941_vm0, %v2494_v36, 0.0  ;;  %v2284_v62 = vadd.f32 %v4952_v23, %v5154_v5  ;;  %v5253_v20 = vpop.f32.mrb[110].mxu1 }
 0x1c0   :  { %v2874_v14 = vadd.f32 %v2873_v46, %v2872_v31  ;;  %v1811_v12 = vpop.f32.mrb[115].mxu0  ;;  %v1820_v18 = vadd.f32 %v5242_v32, %v3834_v35  ;;  %v3129_v13 = vsel %vm941_vm0, %v2611_v6, 0.0  ;;  %v5250_v36 = vsel %vm941_vm0, %v2517_v30, 0.0  ;;  %v5256_v3 = vpop.f32.mrb[111].mxu1 }
 0x1c1   :  { %v2495_v60 = vmax.f32 %v1809_v10, 0.0  ;;  %v1812_v27 = vadd.f32 %v5242_v32, %v1811_v12  ;;  %v3130_v48 = vadd.f32 %v3129_v13, %v3128_v0  ;;  %v2497_v56 = vmax.f32 %v1817_v37, 0.0 }
 0x1c2   :  { %v2876_v5 = vadd.f32 %v2875_v54, %v2874_v14  ;;  %v2613_v31 = vmax.f32 %v2281_v22, 0.0  ;;  %v5259_v10 = vsel %vm941_vm0, %v2515_v40, 0.0  ;;  %v2276_v6 = vadd.f32 %v5242_v32, %v5157_v28 }
 0x1c3   :  { %v2877_v47 = vsel %vm941_vm0, %v2495_v60, 0.0  ;;  %v2496_v46 = vmax.f32 %v1812_v27, 0.0  ;;  %v2498_v54 = vmax.f32 %v1820_v18, 0.0  ;;  %v2614_v37 = vmax.f32 %v2284_v62, 0.0 }
 0x1c4   :  { %v2878_v30 = vadd.f32 %v2877_v47, %v2876_v5  ;;  %v2289_v12 = vadd.f32 %v5242_v32, %v5175_v11  ;;  %v2612_v40 = vmax.f32 %v2276_v6, 0.0  ;;  %v2297_v13 = vadd.f32 %v5242_v32, %v5170_v7 }
 0x1c5   :  { %v2879_v0 = vsel %vm941_vm0, %v2496_v46, 0.0  ;;  %v3837_v14 = vpop.f32.mrb[116].mxu0  ;;  %v2881_v5 = vsel %vm941_vm0, %v2497_v56, 0.0  ;;  %v3133_v47 = vsel %vm941_vm0, %v2613_v31, 0.0  ;;  %v2300_v62 = vadd.f32 %v5242_v32, %v5178_v21 }
 0x1c6   :  { %v2880_v22 = vadd.f32 %v2879_v0, %v2878_v30  ;;  %v1833_v60 = vadd.f32 %v5242_v32, %v3837_v14  ;;  %v1824_v27 = vpop.f32.mrb[117].mxu0  ;;  %v3131_v0 = vsel %vm941_vm0, %v2612_v40, 0.0  ;;  %v2615_v6 = vmax.f32 %v2289_v12, 0.0  ;;  %v5277_v14 = vpop.f32.mrb[112].mxu1 }
 0x1c7   :  { %v1825_v28 = vadd.f32 %v5242_v32, %v1824_v27  ;;  %v3838_v18 = vpop.f32.mrb[118].mxu0  ;;  %v2883_v7 = vsel %vm941_vm0, %v2498_v54, 0.0  ;;  %v3132_v35 = vadd.f32 %v3131_v0, %v3130_v48  ;;  %v5281_v23 = vpop.f32.mrb[113].mxu1  ;;  %v3135_v21 = vsel %vm941_vm0, %v2614_v37, 0.0 }
 0x1c8   :  { %v2882_v46 = vadd.f32 %v2881_v5, %v2880_v22  ;;  %v1836_v11 = vadd.f32 %v5242_v32, %v3838_v18  ;;  %v1827_v30 = vpop.f32.mrb[119].mxu0  ;;  %v2501_v31 = vmax.f32 %v1833_v60, 0.0  ;;  %v2617_v22 = vmax.f32 %v2297_v13, 0.0  ;;  %v5284_v5 = vpop.f32.mrb[114].mxu1 }
 0x1c9   :  { %v2499_v56 = vmax.f32 %v1825_v28, 0.0  ;;  %v1828_v27 = vadd.f32 %v5242_v32, %v1827_v30  ;;  %v3134_v33 = vadd.f32 %v3133_v47, %v3132_v35  ;;  %v5287_v25 = vpop.f32.mrb[115].mxu1  ;;  %v3137_v28 = vsel %vm941_vm0, %v2615_v6, 0.0 }
 0x1ca   :  { %v2884_v34 = vadd.f32 %v2883_v7, %v2882_v46  ;;  %v2502_v12 = vmax.f32 %v1836_v11, 0.0  ;;  %v2618_v48 = vmax.f32 %v2300_v62, 0.0  ;;  %v2292_v60 = vadd.f32 %v5242_v32, %v5183_v1 }
 0x1cb   :  { %v2885_v40 = vsel %vm941_vm0, %v2499_v56, 0.0  ;;  %v2500_v18 = vmax.f32 %v1828_v27, 0.0  ;;  %v3136_v13 = vadd.f32 %v3135_v21, %v3134_v33  ;;  %v2313_v30 = vadd.f32 %v5242_v32, %v5203_v59 }
 0x1cc   :  { %v2886_v54 = vadd.f32 %v2885_v40, %v2884_v34  ;;  %v2305_v11 = vadd.f32 %v5242_v32, %v5208_v63  ;;  %v2889_v35 = vsel %vm941_vm0, %v2501_v31, 0.0  ;;  %v2616_v62 = vmax.f32 %v2292_v60, 0.0  ;;  %v5304_v40 = vpop.f32.mrb[116].mxu1 }
 0x1cd   :  { %v2887_v46 = vsel %vm941_vm0, %v2500_v18, 0.0  ;;  %v3841_v37 = vpop.f32.mrb[120].mxu0  ;;  %v2891_v6 = vsel %vm941_vm0, %v2502_v12, 0.0  ;;  %v3141_v33 = vsel %vm941_vm0, %v2617_v22, 0.0  ;;  %v3138_v56 = vadd.f32 %v3137_v28, %v3136_v13 }
 0x1ce   :  { %v2888_v47 = vadd.f32 %v2887_v46, %v2886_v54  ;;  %v1849_v34 = vadd.f32 %v5242_v32, %v3841_v37  ;;  %v1840_v0 = vpop.f32.mrb[121].mxu0  ;;  %v3139_v63 = vsel %vm941_vm0, %v2616_v62, 0.0  ;;  %v2619_v31 = vmax.f32 %v2305_v11, 0.0  ;;  %v5307_v46 = vpop.f32.mrb[117].mxu1 }
 0x1cf   :  { %v1841_v1 = vadd.f32 %v5242_v32, %v1840_v0  ;;  %v3842_v7 = vpop.f32.mrb[122].mxu0  ;;  %v3140_v60 = vadd.f32 %v3139_v63, %v3138_v56  ;;  %v2621_v12 = vmax.f32 %v2313_v30, 0.0  ;;  %v3143_v22 = vsel %vm941_vm0, %v2618_v48, 0.0  ;;  %v5312_v13 = vpop.f32.mrb[118].mxu1 }
 0x1d0   :  { %v2890_v27 = vadd.f32 %v2889_v35, %v2888_v47  ;;  %v1852_v59 = vadd.f32 %v5242_v32, %v3842_v7  ;;  %v1843_v21 = vpop.f32.mrb[123].mxu0  ;;  %v2505_v37 = vmax.f32 %v1849_v34, 0.0  ;;  %v2316_v28 = vadd.f32 %v5242_v32, %v5212_v4 }
 0x1d1   :  { %v2503_v18 = vmax.f32 %v1841_v1, 0.0  ;;  %v1844_v54 = vadd.f32 %v5242_v32, %v1843_v21  ;;  %v3142_v62 = vadd.f32 %v3141_v33, %v3140_v60  ;;  %v5315_v1 = vpop.f32.mrb[119].mxu1  ;;  %v3145_v30 = vsel %vm941_vm0, %v2619_v31, 0.0 }
 0x1d2   :  { %v2892_v0 = vadd.f32 %v2891_v6, %v2890_v27  ;;  %v2506_v35 = vmax.f32 %v1852_v59, 0.0  ;;  %v2308_v34 = vadd.f32 %v5242_v32, %v5216_v45  ;;  %v2329_v48 = vadd.f32 %v5242_v32, %v5237_v39 }
 0x1d3   :  { %v2893_v11 = vsel %vm941_vm0, %v2503_v18, 0.0  ;;  %v2504_v47 = vmax.f32 %v1844_v54, 0.0  ;;  %v3149_v56 = vsel %vm941_vm0, %v2621_v12, 0.0  ;;  %v3144_v27 = vadd.f32 %v3143_v22, %v3142_v62  ;;  %v5331_v62 = vpop.f32.mrb[120].mxu1 }
 0x1d4   :  { %v2894_v7 = vadd.f32 %v2893_v11, %v2892_v0  ;;  %v2321_v33 = vadd.f32 %v5242_v32, %v5247_v44  ;;  %v2622_v31 = vmax.f32 %v2316_v28, 0.0  ;;  %v2620_v18 = vmax.f32 %v2308_v34, 0.0 }
 0x1d5   :  { %v2895_v4 = vsel %vm941_vm0, %v2504_v47, 0.0  ;;  %v3845_v6 = vpop.f32.mrb[124].mxu0  ;;  %v2897_v45 = vsel %vm941_vm0, %v2505_v37, 0.0  ;;  %v3146_v60 = vadd.f32 %v3145_v30, %v3144_v27  ;;  %v2625_v0 = vmax.f32 %v2329_v48, 0.0 }
 0x1d6   :  { %v2896_v59 = vadd.f32 %v2895_v4, %v2894_v7  ;;  %v1865_v21 = vadd.f32 %v5242_v32, %v3845_v6  ;;  %v1856_v63 = vpop.f32.mrb[125].mxu0  ;;  %v2899_v11 = vsel %vm941_vm0, %v2506_v35, 0.0  ;;  %v3147_v47 = vsel %vm941_vm0, %v2620_v18, 0.0  ;;  %v5335_v4 = vpop.f32.mrb[121].mxu1 }
 0x1d7   :  { %v1857_v54 = vadd.f32 %v5242_v32, %v1856_v63  ;;  %v3846_v39 = vpop.f32.mrb[126].mxu0  ;;  %v2623_v44 = vmax.f32 %v2321_v33, 0.0  ;;  %v3148_v37 = vadd.f32 %v3147_v47, %v3146_v60  ;;  %v3151_v48 = vsel %vm941_vm0, %v2622_v31, 0.0  ;;  %v5340_v27 = vpop.f32.mrb[122].mxu1 }
 0x1d8   :  { %v2898_v12 = vadd.f32 %v2897_v45, %v2896_v59  ;;  %v1859_v22 = vpop.f32.mrb[127].mxu0  ;;  %v1868_v28 = vadd.f32 %v5242_v32, %v3846_v39  ;;  %v2509_v6 = vmax.f32 %v1865_v21, 0.0  ;;  %v2332_v35 = vadd.f32 %v5242_v32, %v5253_v20  ;;  %v5344_v45 = vpop.f32.mrb[123].mxu1 }
 0x1d9   :  { %v2507_v7 = vmax.f32 %v1857_v54, 0.0  ;;  %v1860_v34 = vadd.f32 %v5242_v32, %v1859_v22  ;;  %v3150_v63 = vadd.f32 %v3149_v56, %v3148_v37  ;;  %v3157_v18 = vsel %vm941_vm0, %v2625_v0, 0.0 }
 0x1da   :  { %v2900_v30 = vadd.f32 %v2899_v11, %v2898_v12  ;;  %v3153_v39 = vsel %vm941_vm0, %v2623_v44, 0.0  ;;  %v2324_v21 = vadd.f32 %v5242_v32, %v5256_v3  ;;  %v2345_v31 = vadd.f32 %v5242_v32, %v5277_v14 }
 0x1db   :  { %v2901_v33 = vsel %vm941_vm0, %v2507_v7, 0.0  ;;  %v2508_v59 = vmax.f32 %v1860_v34, 0.0  ;;  %v2510_v20 = vmax.f32 %v1868_v28, 0.0  ;;  %v3152_v12 = vadd.f32 %v3151_v48, %v3150_v63 }
 0x1dc   :  { %v2902_v54 = vadd.f32 %v2901_v33, %v2900_v30  ;;  %v2337_v56 = vadd.f32 %v5242_v32, %v5281_v23  ;;  %v2905_v0 = vsel %vm941_vm0, %v2509_v6, 0.0  ;;  %v2626_v7 = vmax.f32 %v2332_v35, 0.0 }
 0x1dd   :  { %v2903_v60 = vsel %vm941_vm0, %v2508_v59, 0.0  ;;  %v3849_v11 = vpop.f32.mrb[128].mxu0  ;;  %v2624_v44 = vmax.f32 %v2324_v21, 0.0  ;;  %v3154_v14 = vadd.f32 %v3153_v39, %v3152_v12  ;;  %v2629_v28 = vmax.f32 %v2345_v31, 0.0 }
 0x1de   :  { %v2904_v22 = vadd.f32 %v2903_v60, %v2902_v54  ;;  %v1872_v47 = vpop.f32.mrb[129].mxu0  ;;  %v1881_v34 = vadd.f32 %v5242_v32, %v3849_v11  ;;  %v2627_v23 = vmax.f32 %v2337_v56, 0.0  ;;  %v2907_v6 = vsel %vm941_vm0, %v2510_v20, 0.0 }
 0x1df   :  { %v1873_v3 = vadd.f32 %v5242_v32, %v1872_v47  ;;  %v3850_v37 = vpop.f32.mrb[130].mxu0  ;;  %v3155_v59 = vsel %vm941_vm0, %v2624_v44, 0.0  ;;  %v5526_v21 = vmax.f32 %v5220_v29, 0.0  ;;  %v3159_v31 = vsel %vm941_vm0, %v2626_v7, 0.0 }
 0x1e0   :  { %v2906_v30 = vadd.f32 %v2905_v0, %v2904_v22  ;;  %v1884_v33 = vadd.f32 %v5242_v32, %v3850_v37  ;;  %v1875_v48 = vpop.f32.mrb[131].mxu0  ;;  %v3156_v54 = vadd.f32 %v3155_v59, %v3154_v14  ;;  %v2348_v11 = vadd.f32 %v5242_v32, %v5284_v5 }
 0x1e1   :  { %v2511_v63 = vmax.f32 %v1873_v3, 0.0  ;;  %v1876_v35 = vadd.f32 %v5242_v32, %v1875_v48  ;;  %v5364_v60 = vsel %vm941_vm0, %v5526_v21, 0.0  ;;  %v2513_v12 = vmax.f32 %v1881_v34, 0.0 }
 0x1e2   :  { %v2908_v39 = vadd.f32 %v2907_v6, %v2906_v30  ;;  %v3158_v56 = vadd.f32 %v3157_v18, %v3156_v54  ;;  %v3165_v20 = vsel %vm941_vm0, %v2629_v28, 0.0  ;;  %v2514_v47 = vmax.f32 %v1884_v33, 0.0 }
 0x1e3   :  { %v2512_v0 = vmax.f32 %v1876_v35, 0.0  ;;  %v3161_v44 = vsel %vm941_vm0, %v2627_v23, 0.0  ;;  %v2340_v29 = vadd.f32 %v5242_v32, %v5287_v25  ;;  %v2915_v3 = vsel %vm941_vm0, %v2511_v63, 0.0 }
 0x1e4   :  { %v2909_v22 = vrot.slane %v2908_v39, 4  ;;  %v3160_v7 = vadd.f32 %v3159_v31, %v3158_v56  ;;  %v2353_v5 = vadd.f32 %v5242_v32, %v5307_v46  ;;  %v2630_v18 = vmax.f32 %v2348_v11, 0.0 }
 0x1e5   :  { %v2916_v37 = vsel %vm941_vm0, %v2512_v0, 0.0  ;;  %v2628_v30 = vmax.f32 %v2340_v29, 0.0  ;;  %v2918_v28 = vsel %vm941_vm0, %v2513_v12, 0.0  ;;  %v2361_v48 = vadd.f32 %v5242_v32, %v5304_v40 }
 0x1e6   :  { %v2910_v34 = vadd.f32 %v2909_v22, %v2908_v39  ;;  %v2917_v14 = vadd.f32 %v2916_v37, %v2915_v3  ;;  %v3162_v33 = vadd.f32 %v3161_v44, %v3160_v7  ;;  %v2356_v25 = vadd.f32 %v5242_v32, %v5315_v1 }
 0x1e7   :  { %v3163_v6 = vsel %vm941_vm0, %v2628_v30, 0.0  ;;  %v2631_v63 = vmax.f32 %v2353_v5, 0.0  ;;  %v5527_v46 = vmax.f32 %v5232_v38, 0.0  ;;  %v2920_v54 = vsel %vm941_vm0, %v2514_v47, 0.0 }
 0x1e8   :  { %v2911_v59 = vrot.slane %v2910_v34, 2  ;;  %v2919_v23 = vadd.f32 %v2918_v28, %v2917_v14  ;;  %v3164_v21 = vadd.f32 %v3163_v6, %v3162_v33  ;;  %v2364_v39 = vadd.f32 %v5242_v32, %v5312_v13 }
 0x1e9   :  { %v2924_v35 = vsel %vm941_vm0, %v5527_v46, 0.0  ;;  %v3167_v11 = vsel %vm941_vm0, %v2630_v18, 0.0  ;;  %v2632_v1 = vmax.f32 %v2356_v25, 0.0  ;;  %v1913_v12 = vadd.f32 %v5242_v32, %v4692_v43 }
 0x1ea   :  { %v2912_v31 = vadd.f32 %v2911_v59, %v2910_v34  ;;  %v2921_v40 = vadd.f32 %v2920_v54, %v2919_v23  ;;  %v1905_v0 = vadd.f32 %v5242_v32, %v4700_v50  ;;  %v3166_v38 = vadd.f32 %v3165_v20, %v3164_v21 }
 0x1eb   :  { %v2633_v56 = vmax.f32 %v2361_v48, 0.0  ;;  %v3169_v44 = vsel %vm941_vm0, %v2631_v63, 0.0  ;;  %v2369_v13 = vadd.f32 %v5242_v32, %v5335_v4  ;;  %v1908_v29 = vadd.f32 %v5242_v32, %v4710_v57 }
 0x1ec   :  { %v2913_v22 = vrot.slane %v2912_v31, 1  ;;  %v2923_v47 = vadd.f32 %v5259_v10, %v2921_v40  ;;  %v3168_v3 = vadd.f32 %v3167_v11, %v3166_v38  ;;  %v2634_v37 = vmax.f32 %v2364_v39, 0.0 }
 0x1ed   :  { %v3171_v5 = vsel %vm941_vm0, %v2632_v1, 0.0  ;;  %v2372_v50 = vadd.f32 %v5242_v32, %v5344_v45  ;;  %v5528_v20 = vmov 0.0   ;;  %v2521_v10 = vmax.f32 %v1913_v12, 0.0 }
 0x1ee   :  { %v2914_v7 = vadd.f32 %v2913_v22, %v2912_v31  ;;  %v2925_v43 = vadd.f32 %v2924_v35, %v2923_v47  ;;  %3979 = vmatprep.mubr.msk.bf16.mxu1 %vm4149_vm3, %v5528_v20  ;;  %v2519_v34 = vmax.f32 %v1905_v0, 0.0  ;;  %v3173_v14 = vsel %vm941_vm0, %v2633_v56, 0.0 }
 0x1ef   :  { %v3170_v4 = vadd.f32 %v3169_v44, %v3168_v3  ;;  %v2377_v30 = vadd.f32 %v5242_v32, %v5331_v62  ;;  %v2635_v28 = vmax.f32 %v2369_v13, 0.0  ;;  %v1916_v33 = vadd.f32 %v5242_v32, %v4703_v52 }
 0x1f0   :  { %v3194_v18 = vmul.f32 0.00390625, %v2914_v7  ;;  %v2927_v57 = vadd.f32 %v5250_v36, %v2925_v43  ;;  %v2520_v48 = vmax.f32 %v1908_v29, 0.0  ;;  %v3175_v45 = vsel %vm941_vm0, %v2634_v37, 0.0 }
 0x1f1   :  { %v3172_v25 = vadd.f32 %v3171_v5, %v3170_v4  ;;  %v2380_v6 = vadd.f32 %v5242_v32, %v5340_v27  ;;  %v2636_v63 = vmax.f32 %v2372_v50, 0.0  ;;  %v2930_v36 = vsel %vm941_vm0, %v2519_v34, 0.0 }
 0x1f2   :  { %v3202_v59 = vpack.c.bf16 %v3194_v18, %v3194_v18  ;;  %v2929_v23 = vadd.f32 %v5364_v60, %v2927_v57  ;;  %v1921_v62 = vadd.f32 %v5242_v32, %v4732_v15  ;;  %v2637_v54 = vmax.f32 %v2377_v30, 0.0 }
 0x1f3   :  { %v3174_v46 = vadd.f32 %v3173_v14, %v3172_v25  ;;  %v3177_v21 = vsel %vm941_vm0, %v2635_v28, 0.0  ;;  %v2522_v39 = vmax.f32 %v1916_v33, 0.0  ;;  %v2932_v31 = vsel %vm941_vm0, %v2520_v48, 0.0 }
 0x1f4   :  { %v3229_v35 = vunpack.c.l.b16 %v3202_v59  ;;  %v2931_v52 = vadd.f32 %v2930_v36, %v2929_v23  ;;  %v1924_v60 = vadd.f32 %v5242_v32, %v4742_v24  ;;  %v2638_v1 = vmax.f32 %v2380_v6, 0.0 }
 0x1f5   :  { %v3176_v27 = vadd.f32 %v3175_v45, %v3174_v46  ;;  %v3179_v15 = vsel %vm941_vm0, %v2636_v63, 0.0  ;;  %v2934_v12 = vsel %vm941_vm0, %v2521_v10, 0.0  ;;  %v1929_v0 = vadd.f32 %v5242_v32, %v4724_v8 }
 0x1f6   :  { %v5422_v40 = vsel %vm3238_vm4, %v3229_v35, %v5192_v2  ;;  %v2933_v11 = vadd.f32 %v2932_v31, %v2931_v52  ;;  %v2523_v38 = vmax.f32 %v1921_v62, 0.0  ;;  %v3181_v47 = vsel %vm941_vm0, %v2637_v54, 0.0 }
 0x1f7   :  { %v3178_v56 = vadd.f32 %v3177_v21, %v3176_v27  ;;  %v2936_v24 = vsel %vm941_vm0, %v2522_v39, 0.0  ;;  %v1932_v2 = vadd.f32 %v5242_v32, %v4735_v17  ;;  %v2524_v44 = vmax.f32 %v1924_v60, 0.0 }
 0x1f8   :  { %v2935_v22 = vadd.f32 %v2934_v12, %v2933_v11  ;;  %v3183_v3 = vsel %vm941_vm0, %v2638_v1, 0.0  ;;  %v2525_v37 = vmax.f32 %v1929_v0, 0.0  ;;  %v2938_v7 = vsel %vm941_vm0, %v2523_v38, 0.0 }
 0x1f9   :  { %v3180_v13 = vadd.f32 %v3179_v15, %v3178_v56  ;;  %v1937_v8 = vadd.f32 %v5242_v32, %v4764_v49  ;;  %v2526_v50 = vmax.f32 %v1932_v2, 0.0  ;;  %v2940_v20 = vsel %vm941_vm0, %v2524_v44, 0.0 }
 0x1fa   :  { %v2937_v29 = vadd.f32 %v2936_v24, %v2935_v22  ;;  %v1940_v10 = vadd.f32 %v5242_v32, %v4771_v58  ;;  %v2942_v14 = vsel %vm941_vm0, %v2525_v37, 0.0  ;;  %v1945_v4 = vadd.f32 %v5242_v32, %v4756_v41  ;;  %v5532_v37 = vld [vmem:[#allocation10_spill] sm:$0xff] }
 0x1fb   :  { %v3182_v43 = vadd.f32 %v3181_v47, %v3180_v13  ;;  %v2527_v18 = vmax.f32 %v1937_v8, 0.0  ;;  %v2944_v49 = vsel %vm941_vm0, %v2526_v50, 0.0  ;;  %v1948_v30 = vadd.f32 %v5242_v32, %v4767_v53  ;;  %v5529_v47 = vld [vmem:[#allocation6_spill] sm:$0xff] }
 0x1fc   :  { %v2939_v5 = vadd.f32 %v2938_v7, %v2937_v29  ;;  %v2528_v28 = vmax.f32 %v1940_v10, 0.0  ;;  %v2529_v48 = vmax.f32 %v1945_v4, 0.0  ;;  %v1953_v45 = vadd.f32 %v5242_v32, %v4786_v16  ;;  %v5531_v29 = vld [vmem:[#allocation9_spill] sm:$0xff] }
 0x1fd   :  { %v5439_v17 = vadd.f32 %v3183_v3, %v3182_v43  ;;  %v2946_v58 = vsel %vm941_vm0, %v2527_v18, 0.0  ;;  %v2530_v59 = vmax.f32 %v1948_v30, 0.0  ;;  %v1956_v41 = vadd.f32 %v5242_v32, %v4792_v26  ;;  %v5533_v43 = vld [vmem:[#allocation5_spill] sm:$0xff] }
 0x1fe   :  { %v2941_v34 = vadd.f32 %v2940_v20, %v2939_v5  ;;  %v2948_v23 = vsel %vm941_vm0, %v2528_v28, 0.0  ;;  %v2950_v63 = vsel %vm941_vm0, %v2529_v48, 0.0  ;;  %v1961_v53 = vadd.f32 %v5242_v32, %v4781_v9 }
 0x1ff   :  { %v2531_v36 = vmax.f32 %v1953_v45, 0.0  ;;  %v2952_v46 = vsel %vm941_vm0, %v2530_v59, 0.0  ;;  %v1964_v16 = vadd.f32 %v5242_v32, %v4789_v19  ;;  %v2532_v35 = vmax.f32 %v1956_v41, 0.0 }
 0x200   :  { %v2943_v57 = vadd.f32 %v2942_v14, %v2941_v34  ;;  %v2533_v54 = vmax.f32 %v1961_v53, 0.0  ;;  %v1969_v26 = vadd.f32 %v5242_v32, %v4803_v51  ;;  %v1972_v9 = vadd.f32 %v5242_v32, %v4808_v61  ;;  %v5534_v14 = vld [vmem:[#allocation7_spill] sm:$0xff] }
 0x201   :  { %v2954_v21 = vsel %vm941_vm0, %v2531_v36, 0.0  ;;  %v2534_v31 = vmax.f32 %v1964_v16, 0.0  ;;  %v2956_v60 = vsel %vm941_vm0, %v2532_v35, 0.0  ;;  %v1977_v19 = vadd.f32 %v5242_v32, %v4798_v42  ;;  %v5530_v42 = vld [vmem:[#allocation8_spill] sm:$0xff] }
 0x202   :  { %v2945_v33 = vadd.f32 %v2944_v49, %v2943_v57  ;;  %v2958_v11 = vsel %vm941_vm0, %v2533_v54, 0.0  ;;  %v2535_v1 = vmax.f32 %v1969_v26, 0.0  ;;  %v1980_v51 = vadd.f32 %v5242_v32, %v4805_v55 }
 0x203   :  { %v2960_v12 = vsel %vm941_vm0, %v2534_v31, 0.0  ;;  %v2536_v0 = vmax.f32 %v1972_v9, 0.0  ;;  %v2537_v56 = vmax.f32 %v1977_v19, 0.0  ;;  %v1985_v61 = vadd.f32 %v5242_v32, %v5529_v47 }
 0x204   :  { %v2947_v25 = vadd.f32 %v2946_v58, %v2945_v33  ;;  %v2962_v22 = vsel %vm941_vm0, %v2535_v1, 0.0  ;;  %v2538_v2 = vmax.f32 %v1980_v51, 0.0  ;;  %v1988_v13 = vadd.f32 %v5242_v32, %v5530_v42 }
 0x205   :  { %v2964_v44 = vsel %vm941_vm0, %v2536_v0, 0.0  ;;  %v3047_v3 = vrot.slane %v5531_v29, 4  ;;  %v3116_v7 = vrot.slane %v5532_v37, 4  ;;  %v2966_v8 = vsel %vm941_vm0, %v2537_v56, 0.0 }
 0x206   :  { %v2949_v6 = vadd.f32 %v2948_v23, %v2947_v25  ;;  %v1993_v5 = vadd.f32 %v5242_v32, %v5533_v43  ;;  %v2539_v50 = vmax.f32 %v1985_v61, 0.0  ;;  %v3185_v20 = vrot.slane %v5439_v17, 4 }
 0x207   :  { %v2968_v34 = vsel %vm941_vm0, %v2538_v2, 0.0  ;;  %v1996_v4 = vadd.f32 %v5242_v32, %v5534_v14  ;;  %v2540_v18 = vmax.f32 %v1988_v13, 0.0  ;;  %v3048_v57 = vadd.f32 %v3047_v3, %v5531_v29  ;;  %v3578_v3 = vld [vmem:[%s5515_s4] ss:$0 sm:$0xff] }
 0x208   :  { %v2951_v62 = vadd.f32 %v2950_v63, %v2949_v6  ;;  %v3117_v49 = vadd.f32 %v3116_v7, %v5532_v37  ;;  %v2541_v28 = vmax.f32 %v1993_v5, 0.0  ;;  %v2970_v33 = vsel %vm941_vm0, %v2539_v50, 0.0 }
 0x209   :  { %v3186_v48 = vadd.f32 %v3185_v20, %v5439_v17  ;;  %v2542_v45 = vmax.f32 %v1996_v4, 0.0  ;;  %v2972_v25 = vsel %vm941_vm0, %v2540_v18, 0.0  ;;  %v3049_v59 = vrot.slane %v3048_v57, 2 }
 0x20a   :  { %v2953_v52 = vadd.f32 %v2952_v46, %v2951_v62  ;;  %v3118_v23 = vrot.slane %v3117_v49, 2  ;;  %v2974_v32 = vsel %vm941_vm0, %v2541_v28, 0.0 }
 0x20b   :  { %v3187_v6 = vrot.slane %v3186_v48, 2  ;;  %v2976_v53 = vsel %vm941_vm0, %v2542_v45, 0.0  ;;  %v3050_v36 = vadd.f32 %v3049_v59, %v3048_v57 }
 0x20c   :  { %v2955_v39 = vadd.f32 %v2954_v21, %v2953_v52  ;;  %v3119_v62 = vadd.f32 %v3118_v23, %v3117_v49 }
 0x20d   :  { %v3188_v16 = vadd.f32 %v3187_v6, %v3186_v48  ;;  %v3051_v52 = vrot.slane %v3050_v36, 1 }
 0x20e   :  { %v2957_v27 = vadd.f32 %v2956_v60, %v2955_v39  ;;  %v3120_v17 = vrot.slane %v3119_v62, 1 }
 0x20f   :  { %v3189_v21 = vrot.slane %v3188_v16, 1  ;;  %v3052_v39 = vadd.f32 %v3051_v52, %v3050_v36 }
 0x210   :  { %v2959_v15 = vadd.f32 %v2958_v11, %v2957_v27  ;;  %v3121_v31 = vadd.f32 %v3120_v17, %v3119_v62 }
 0x211   :  { %v3190_v9 = vadd.f32 %v3189_v21, %v3188_v16  ;;  %v3196_v11 = vmul.f32 0.00390625, %v3052_v39 }
 0x212   :  { %v2961_v38 = vadd.f32 %v2960_v12, %v2959_v15  ;;  %v3197_v19 = vmul.f32 0.00390625, %v3121_v31 }
 0x213   :  { %v3198_v15 = vmul.f32 0.00390625, %v3190_v9  ;;  %v3204_v51 = vpack.c.bf16 %v3196_v11, %v3196_v11 }
 0x214   :  { %v2963_v24 = vadd.f32 %v2962_v22, %v2961_v38  ;;  %v3205_v0 = vpack.c.bf16 %v3197_v19, %v3197_v19 }
 0x215   :  { %v3206_v56 = vpack.c.bf16 %v3198_v15, %v3198_v15  ;;  %v3231_v47 = vunpack.c.l.b16 %v3204_v51 }
 0x216   :  { %v2965_v55 = vadd.f32 %v2964_v44, %v2963_v24  ;;  %v3232_v61 = vunpack.c.l.b16 %v3205_v0 }
 0x217   :  { %v3233_v2 = vunpack.c.l.b16 %v3206_v56 }
 0x218   :  { %v2967_v10 = vadd.f32 %v2966_v8, %v2965_v55 }
 0x21a   :  { %v2969_v30 = vadd.f32 %v2968_v34, %v2967_v10 }
 0x21c   :  { %v2971_v58 = vadd.f32 %v2970_v33, %v2969_v30 }
 0x21e   :  { %v2973_v41 = vadd.f32 %v2972_v25, %v2971_v58 }
 0x220   :  { %v2975_v63 = vadd.f32 %v2974_v32, %v2973_v41 }
 0x222   :  { %v2977_v46 = vadd.f32 %v2976_v53, %v2975_v63 }
 0x224   :  { %v2978_v35 = vrot.slane %v2977_v46, 4 }
 0x226   :  { %v2979_v54 = vadd.f32 %v2978_v35, %v2977_v46 }
 0x228   :  { %v2980_v26 = vrot.slane %v2979_v54, 2 }
 0x22a   :  { %v2981_v60 = vadd.f32 %v2980_v26, %v2979_v54 }
 0x22c   :  { %v2982_v27 = vrot.slane %v2981_v60, 1 }
 0x22e   :  { %v2983_v1 = vadd.f32 %v2982_v27, %v2981_v60 }
 0x230   :  { %v3195_v12 = vmul.f32 0.00390625, %v2983_v1 }
 0x232   :  { %v3203_v38 = vpack.c.bf16 %v3195_v12, %v3195_v12 }
 0x234   :  { %v3230_v22 = vunpack.c.l.b16 %v3203_v38 }
 0x236   :  { %v3241_v24 = vsel %vm3240_vm5, %v3230_v22, %v5422_v40 }
 0x237   :  { %v3243_v44 = vsel %vm3242_vm6, %v3231_v47, %v3241_v24 }
 0x238   :  { %v3245_v42 = vsel %vm3244_vm7, %v3232_v61, %v3243_v44 }
 0x239   :  { %v3247_v13 = vsel %vm3246_vm8, %v3233_v2, %v3245_v42 }
 0x23a   :  { %v3248_v29 = vpack.c.b16 %v3247_v13, %v3247_v13 }
 0x23c   :  { %3980 = vmatmul.mubr.msk.bf16.vlgmr.msra.gmra.mrb[124].mxu1 %vm941_vm0, %v3248_v29 }
 0x30f   :  { %v3298_v37 = vpop.f32.mrb[124].mxu1 }
 0x310   :  { %v3299_v7 = vadd.f32 %v3578_v3, %v3298_v37  ;;  %v3981_v55 = vpop.f32.mrb[125].mxu1 }
 0x311   :  { %v3301_v8 = vpop.f32.mrb[126].mxu1 }
 0x312   :  { %3304 = vst.msk [vmem:[#allocation2] sm:$0xff] %vm941_vm0, %v3299_v7  ;;  %v3982_v40 = vpop.f32.mrb[127].mxu1 }
 0x313   :  { %4135 = shalt.err (!%p4132_p4)
}
 0x314   :  { %s4136_s4 = scalar_lea.hbm %s5516_s5, 128 }
 0x315   :  { %p4137_p5 = scmp.ne.s32.totalorder %s5516_s5, %s4136_s4  ;;  %p4140_p6 = scmp.lt.u32.totalorder %s4136_s4, %s5516_s5 }
 0x317   :  { %p4142_p7 = pnand %p4140_p6, %p4137_p5 }
 0x319   :  { %4145 = shalt.err (!%p4142_p7)
}
 0x31a   :  { %3314 = dma.vmem_to_hbm [thread:$0]  %s3312_s27, 128, %s5516_s5, [#allocation3]  }
 0x31b   :  { %4146 = dma.done.wait [#allocation3], 128  }
 0x31c   :  { %4147 = vsyncadd [#allocation3], 4294967168 }
 0x31d   :  { %3318 = vsyncpa [#allocation3], 1 }

</bundles_post_ra>
